<compile_context>
chip_gen: v5e
topology: v5e:2x2
jax: 0.10.0
libtpu: 0.0.40
codegen_flags: <defaults>
</compile_context>

<pallas_src>
import jax
import jax.numpy as jnp
from jax import lax
from jax.experimental import pallas as pl
from jax.experimental.pallas import tpu as pltpu


# ----------------------------------------------------------------------------- helpers
def _round_up(x, m):
    return ((x + m - 1) // m) * m


def _pick_tile(dim, mult, target):
    """Largest divisor of `dim` that is a multiple of `mult` and <= target."""
    best = mult
    d = mult
    stop = min(dim, target)
    while d <= stop:
        if dim % d == 0:
            best = d
        d += mult
    return best


def _pad_to(x, shape):
    return jnp.pad(x, [(0, s - d) for d, s in zip(x.shape, shape)])


# ------------------------------------------------- generic tiled  y = x @ w + b  kernel
def _matmul_bias_kernel(x_ref, w_ref, b_ref, o_ref):
    o_ref[...] = (jnp.dot(x_ref[...], w_ref[...],
                          preferred_element_type=jnp.float32) + b_ref[...])


def matmul_bias(x, w, b, *, tm_target=256, tn_target=512):
    M, K = x.shape
    _, N = w.shape
    tm = _pick_tile(M, 8, tm_target)
    tn = _pick_tile(N, 128, tn_target)
    return pl.pallas_call(
        _matmul_bias_kernel,
        out_shape=jax.ShapeDtypeStruct((M, N), jnp.float32),
        grid=(M // tm, N // tn),
        in_specs=[
            pl.BlockSpec((tm, K), lambda i, j: (i, 0)),
            pl.BlockSpec((K, tn), lambda i, j: (0, j)),
            pl.BlockSpec((1, tn), lambda i, j: (0, j)),
        ],
        out_specs=pl.BlockSpec((tm, tn), lambda i, j: (i, j)),
        compiler_params=pltpu.CompilerParams(
            dimension_semantics=("parallel", "parallel"),
            vmem_limit_bytes=32 * 1024 * 1024),
    )(x, w, b)


# -------------------------------------------------------------- sequential LSTM kernel
def _lstm_recurrence_kernel(h0_ref, gih_ref, whh_ref, hout_ref, h_scr, c_scr):
    """One block of TT timesteps. Gate column order is (i, f, o, g), lane-aligned."""
    Hp = h_scr.shape[-1]
    TT = gih_ref.shape[0]

    @pl.when(pl.program_id(0) == 0)
    def _():
        h_scr[...] = h0_ref[...]                 # h0 = proj(features)
        c_scr[...] = jnp.zeros_like(c_scr)       # c0 = 0

    def step(s, carry):
        # Input->hidden matmul + bias already precomputed outside the loop;
        # only h @ W_hh is left on the serial critical path.
        gates = gih_ref[s] + jnp.dot(h_scr[...], whh_ref[...],
                                     preferred_element_type=jnp.float32)
        sig = jax.nn.sigmoid(gates[:, :3 * Hp])  # (i, f, o) as one contiguous slab
        i = sig[:, 0 * Hp:1 * Hp]
        f = sig[:, 1 * Hp:2 * Hp]
        o = sig[:, 2 * Hp:3 * Hp]
        g = jnp.tanh(gates[:, 3 * Hp:4 * Hp])
        c_new = f * c_scr[...] + i * g
        h_new = o * jnp.tanh(c_new)
        c_scr[...] = c_new
        h_scr[...] = h_new
        hout_ref[s] = h_new
        return carry

    lax.fori_loop(0, TT, step, 0, unroll=True)


def lstm_recurrence(h0, gates_ih, whh, *, tt_target=4):
    T, Bp, G = gates_ih.shape
    Hp = h0.shape[-1]
    TT = _pick_tile(T, 1, tt_target)
    return pl.pallas_call(
        _lstm_recurrence_kernel,
        out_shape=jax.ShapeDtypeStruct((T, Bp, Hp), jnp.float32),
        grid=(T // TT,),
        in_specs=[
            pl.BlockSpec((Bp, Hp), lambda tb: (0, 0)),          # h0 (resident)
            pl.BlockSpec((TT, Bp, G), lambda tb: (tb, 0, 0)),   # gates_ih block (piped)
            pl.BlockSpec((Hp, G), lambda tb: (0, 0)),           # W_hh (resident)
        ],
        out_specs=pl.BlockSpec((TT, Bp, Hp), lambda tb: (tb, 0, 0)),
        scratch_shapes=[pltpu.VMEM((Bp, Hp), jnp.float32),      # h state
                        pltpu.VMEM((Bp, Hp), jnp.float32)],     # c state
        compiler_params=pltpu.CompilerParams(
            dimension_semantics=("arbitrary",),                 # inherently sequential
            vmem_limit_bytes=32 * 1024 * 1024),
    )(h0, gates_ih, whh)


# -------------------------------------------------------------- deferred FC head kernel
def _fc_head_kernel(h_ref, w_ref, b_ref, o_ref):
    # h_ref: (1, Bp, Hp); w_ref: (Hp, tn); o_ref: (Bp, tn) batch-major slab.
    o_ref[...] = (jnp.dot(h_ref[0], w_ref[...],
                          preferred_element_type=jnp.float32) + b_ref[...])


def fc_head(h_all, wfc, bfc, *, tn_target=512):
    T, Bp, Hp = h_all.shape
    Vp = wfc.shape[1]
    tn = _pick_tile(Vp, 128, tn_target)
    num_vt = Vp // tn
    out = pl.pallas_call(
        _fc_head_kernel,
        out_shape=jax.ShapeDtypeStruct((Bp, T * Vp), jnp.float32),
        grid=(num_vt, T),   # vocab tiles outer -> each W_fc tile is DMA'd once
        in_specs=[
            pl.BlockSpec((1, Bp, Hp), lambda j, t: (t, 0, 0)),
            pl.BlockSpec((Hp, tn), lambda j, t: (0, j)),
            pl.BlockSpec((1, tn), lambda j, t: (0, j)),
        ],
        # Batch-major placement: out[:, t*Vp + j*tn : ...]; reshape to (Bp,T,Vp) is free,
        # so no HBM transpose of the (large) logits tensor is ever materialized.
        out_specs=pl.BlockSpec((Bp, tn), lambda j, t: (0, t * num_vt + j)),
        compiler_params=pltpu.CompilerParams(
            dimension_semantics=("parallel", "parallel"),
            vmem_limit_bytes=32 * 1024 * 1024),
    )(h_all, wfc, bfc)
    return out.reshape(Bp, T, Vp)


# ------------------------------------------------------------------------------ params
def init_params(key, embed_size, hidden_size, vocab_size):
    """Torch-equivalent params, pre-transposed to (in, out); LSTM gate order (i,f,g,o)."""
    ks = jax.random.split(key, 8)
    s_e = 1.0 / float(embed_size) ** 0.5
    s_h = 1.0 / float(hidden_size) ** 0.5
    return dict(
        embed=jax.random.normal(ks[0], (vocab_size, embed_size), jnp.float32),
        wp=jax.random.uniform(ks[1], (embed_size, hidden_size), jnp.float32, -s_e, s_e),
        bp=jax.random.uniform(ks[2], (1, hidden_size), jnp.float32, -s_e, s_e),
        wih=jax.random.uniform(ks[3], (embed_size, 4 * hidden_size), jnp.float32, -s_h, s_h),
        whh=jax.random.uniform(ks[4], (hidden_size, 4 * hidden_size), jnp.float32, -s_h, s_h),
        b=jax.random.uniform(ks[5], (1, 4 * hidden_size), jnp.float32, -s_h, s_h),
        wfc=jax.random.uniform(ks[6], (hidden_size, vocab_size), jnp.float32, -s_h, s_h),
        bfc=jax.random.uniform(ks[7], (1, vocab_size), jnp.float32, -s_h, s_h),
    )


def prepare_kernel_params(p):
    """Pad E/H/V to multiples of 128 and reorder gate columns (i,f,g,o) -> (i,f,o,g)."""
    E, H = p["wp"].shape
    V = p["wfc"].shape[1]
    Ep, Hp, Vp = _round_up(E, 128), _round_up(H, 128), _round_up(V, 128)

    def pad_gates(w, rows_p):
        gi, gf, gg, go = (w[:, k * H:(k + 1) * H] for k in range(4))
        w4 = jnp.concatenate(
            [_pad_to(c, (w.shape[0], Hp)) for c in (gi, gf, go, gg)], axis=1)
        return _pad_to(w4, (rows_p, 4 * Hp))

    return dict(
        dims=(E, H, V, Ep, Hp, Vp),
        embed=_pad_to(p["embed"], (p["embed"].shape[0], Ep)),
        wp=_pad_to(p["wp"], (Ep, Hp)),
        bp=_pad_to(p["bp"], (1, Hp)),
        wih=pad_gates(p["wih"], Ep),
        whh=pad_gates(p["whh"], Hp),
        b=pad_gates(p["b"], 1),
        wfc=_pad_to(p["wfc"], (Hp, Vp)),
        bfc=_pad_to(p["bfc"], (1, Vp)),
    )


# ----------------------------------------------------------------------------- forward
def caption_decoder_forward(features, captions, kparams):
    """features: (B, E) f32, captions: (B, T) int32 -> logits (B, T, V). Training path."""
    E, H, V, Ep, Hp, Vp = kparams["dims"]
    B = features.shape[0]
    T = captions.shape[1]
    Bp = _round_up(B, 8)                       # sublane-aligned batch

    feat_p = _pad_to(features.astype(jnp.float32), (Bp, Ep))
    cap_p = jnp.pad(captions, ((0, Bp - B), (0, 0)))

    # Embedding gather directly time-major (no (B,T,E)->(T,B,E) transpose materialized).
    emb_tm = jnp.take(kparams["embed"], cap_p.T, axis=0)            # (T, Bp, Ep)
    # TODO(synk): the gather itself stays in XLA; fusing it into the kernel via
    # PrefetchScalarGridSpec + pl.Element row-gather is a further optimization.

    # (1) All input->hidden gate pre-activations (+ combined LSTM bias) as ONE big matmul.
    gates_ih = matmul_bias(emb_tm.reshape(T * Bp, Ep),
                           kparams["wih"], kparams["b"]).reshape(T, Bp, 4 * Hp)

    # (2) h0 = proj(features); c0 = 0 (set inside the recurrence kernel).
    h0 = matmul_bias(feat_p, kparams["wp"], kparams["bp"])          # (Bp, Hp)

    # (3) Sequential recurrence — only h @ W_hh left inside the loop.
    h_all = lstm_recurrence(h0, gates_ih, kparams["whh"])           # (T, Bp, Hp)

    # (4) Vocab-sized FC head as a tiled, fully parallel matmul, written batch-major.
    logits = fc_head(h_all, kparams["wfc"], kparams["bfc"])         # (Bp, T, Vp)
    return logits[:B, :, :V]

# TODO(synk): the inference branch (greedy argmax decode with a data-dependent early
# break on end_token across the batch) is not expressible as a static Pallas grid;
# only the training-path forward (captions given) is implemented here.


# --------------------------------------------------------------------------- reference
def reference_forward(features, captions, params):
    """Pure-JAX reference mirroring torch semantics (gate order i,f,g,o)."""
    emb = jnp.take(params["embed"], captions, axis=0)
    h = features @ params["wp"] + params["bp"]
    c = jnp.zeros_like(h)
    H = h.shape[-1]
    outs = []
    for t in range(captions.shape[1]):
        x = emb[:, t, :]
        gates = x @ params["wih"] + h @ params["whh"] + params["b"]
        i = jax.nn.sigmoid(gates[:, :H])
        f = jax.nn.sigmoid(gates[:, H:2 * H])
        g = jnp.tanh(gates[:, 2 * H:3 * H])
        o = jax.nn.sigmoid(gates[:, 3 * H:])
        c = f * c + i * g
        h = o * jnp.tanh(c)
        outs.append(h @ params["wfc"] + params["bfc"])
    return jnp.stack(outs, axis=1)


if __name__ == "__main__":
    jax.config.update("jax_default_matmul_precision", "highest")

    # Small shapes consistent with the module: batch=2, seq=8, embed=32, hidden=32, vocab=128.
    B, T, E, H, V = 2, 8, 32, 32, 128
    key = jax.random.PRNGKey(0)
    kf, kc, kp = jax.random.split(key, 3)

    features = jax.random.normal(kf, (B, E), jnp.float32)
    captions = jax.random.randint(kc, (B, T), 0, V, jnp.int32)
    params = init_params(kp, E, H, V)
    kparams = prepare_kernel_params(params)

    out = caption_decoder_forward(features, captions, kparams)
    out = jax.block_until_ready(out)

    ref = reference_forward(features, captions, params)
    assert out.shape == (B, T, V), out.shape
    assert jnp.allclose(out, ref, atol=2e-4, rtol=2e-4), "mismatch vs reference"

    print("KERNEL_OK")
</pallas_src>

<mosaic_0001>
module attributes {stable_mosaic.version = 11 : i64} {
  func.func @_matmul_bias_kernel(%arg0: i32, %arg1: i32, %arg2: memref<64x128xf32, #tpu.memory_space<vmem>>, %arg3: memref<128x512xf32, #tpu.memory_space<vmem>>, %arg4: memref<1x512xf32, #tpu.memory_space<vmem>>, %arg5: memref<64x512xf32, #tpu.memory_space<vmem>>) attributes {dimension_semantics = [#tpu.dimension_semantics<parallel>, #tpu.dimension_semantics<parallel>], iteration_bounds = array<i64: 1, 1>, scalar_prefetch = 0 : i64, scratch_operands = 0 : i64, tpu.core_type = #tpu.core_type<tc>, window_params = [{transform_indices = @transform_0, window_bounds = array<i64: 64, 128>}, {transform_indices = @transform_1, window_bounds = array<i64: 128, 512>}, {transform_indices = @transform_2, window_bounds = array<i64: 1, 512>}, {transform_indices = @transform_3, window_bounds = array<i64: 64, 512>}]} {
    %c0 = arith.constant 0 : index
    %c0_0 = arith.constant 0 : index
    %0 = vector.load %arg2[%c0, %c0_0] : memref<64x128xf32, #tpu.memory_space<vmem>>, vector<64x128xf32>
    %c0_1 = arith.constant 0 : index
    %c0_2 = arith.constant 0 : index
    %1 = vector.load %arg3[%c0_1, %c0_2] : memref<128x512xf32, #tpu.memory_space<vmem>>, vector<128x512xf32>
    %cst = arith.constant dense<0.000000e+00> : vector<64x512xf32>
    %2 = tpu.matmul %0, %1, %cst {dimension_numbers = #tpu.dot_dimension_numbers<[1], [0], [0], [1], [0, 0, 1, 1], [], []>, precision = #tpu.contract_precision<fp32>} : vector<64x128xf32>, vector<128x512xf32>, vector<64x512xf32> -> vector<64x512xf32>
    %c0_3 = arith.constant 0 : index
    %c0_4 = arith.constant 0 : index
    %3 = vector.load %arg4[%c0_3, %c0_4] : memref<1x512xf32, #tpu.memory_space<vmem>>, vector<1x512xf32>
    %4 = vector.broadcast %3 : vector<1x512xf32> to vector<64x512xf32>
    %5 = arith.addf %2, %4 : vector<64x512xf32>
    %c0_5 = arith.constant 0 : index
    %c0_6 = arith.constant 0 : index
    %6 = vector.load %arg5[%c0_5, %c0_6] : memref<64x512xf32, #tpu.memory_space<vmem>>, vector<64x512xf32>
    tpu.vector_store %arg5[%c0_5, %c0_6], %5 {strides = array<i32>} : memref<64x512xf32, #tpu.memory_space<vmem>>, vector<64x512xf32>,
    return
  }
  func.func @transform_0(%arg0: i32, %arg1: i32) -> (i32, i32) {
    %c0_i32 = arith.constant 0 : i32
    %c0_i32_0 = arith.constant 0 : i32
    return %arg0, %c0_i32 : i32, i32
  }
  func.func @transform_1(%arg0: i32, %arg1: i32) -> (i32, i32) {
    %c0_i32 = arith.constant 0 : i32
    %c0_i32_0 = arith.constant 0 : i32
    return %c0_i32, %arg1 : i32, i32
  }
  func.func @transform_2(%arg0: i32, %arg1: i32) -> (i32, i32) {
    %c0_i32 = arith.constant 0 : i32
    %c0_i32_0 = arith.constant 0 : i32
    return %c0_i32, %arg1 : i32, i32
  }
  func.func @transform_3(%arg0: i32, %arg1: i32) -> (i32, i32) {
    %c0_i32 = arith.constant 0 : i32
    return %arg0, %arg1 : i32, i32
  }
}

</mosaic_0001>

<bundles_post_ra>
// kernel: tpu_custom_call.1
= control target key start
LH: loop header
LB: loop body
LE: loop exit
PB: predicated region body
PF: predicated region fallthrough
CT: control target
= control target key end

     0   :  { %8 = vsyncpa [#allocation3], 0  ;;  %s4143_s0 = inlined_call_operand.hbm [shape: f32[64,128], index: 0, kind: input, shape index: {}]   ;;  %s4144_s1 = inlined_call_operand.hbm [shape: f32[128,512], index: 1, kind: input, shape index: {}]   ;;  %s4145_s2 = inlined_call_operand.hbm [shape: f32[1,512], index: 2, kind: input, shape index: {}]   ;;  %s4146_s3 = inlined_call_operand.hbm [shape: f32[64,512], index: 3, kind: output, shape index: {}]  }
   0x1   :  { %9 = vsyncpa [#allocation6], 0  ;;  %s28_s14 = sshll.u32 %s4144_s1, 4  ;;  %s29_s14 = int_to_ptr.hbm [resolvable:$true] %s28_s14 }
   0x2   :  { %10 = vsyncpa [#allocation4], 0  ;;  %s2537_s15 = smov [#allocation5]   ;;  %s15_s19 = sshll.u32 %s4143_s0, 4  ;;  %s16_s19 = int_to_ptr.hbm [resolvable:$true] %s15_s19 }
   0x3   :  { %s30_s16 = sshll.u32 %s2537_s15, 4  ;;  %s2538_s20 = smov 512   ;;  %s31_s16 = int_to_ptr.vmem [resolvable:$true] %s30_s16 }
   0x4   :  { %s2539_s21 = smov 32   ;;  %s2540_s22 = smov [#allocation2]  }
   0x5   :  { %36 = dma.hbm_to_vmem [thread:$0]  %s29_s14, 8192, %s31_s16, [#allocation6], %s2538_s20, %s2538_s20, %s2539_s21  }
   0x6   :  { %s17_s23 = sshll.u32 %s2540_s22, 4  ;;  %s2541_s1 = smov 128   ;;  %s18_s23 = int_to_ptr.vmem [resolvable:$true] %s17_s23 }
   0x7   :  { %s2542_s24 = smov 8   ;;  %s42_s27 = sshll.u32 %s4145_s2, 4  ;;  %s43_s27 = int_to_ptr.hbm [resolvable:$true] %s42_s27 }
   0x8   :  { %23 = dma.hbm_to_vmem [thread:$0]  %s16_s19, 1024, %s18_s23, [#allocation3], %s2541_s1, %s2541_s1, %s2542_s24  }
   0x9   :  { %s2543_s28 = smov [#allocation7]  }
   0xa   :  { %s44_s0 = sshll.u32 %s2543_s28, 4  ;;  %s45_s0 = int_to_ptr.vmem [resolvable:$true] %s44_s0 }
   0xb   :  { %47 = dma.hbm_to_vmem [thread:$0]  %s43_s27, 64, %s45_s0, [#allocation6]  }
   0xc   :  { %2531 = dma.done.wait [#allocation3], 1024  }
   0xd   :  { %2532 = vsyncadd [#allocation3], 4294966272 }
   0xe   :  { %2533 = dma.done.wait [#allocation6], 8256  }
   0xf   :  { %2534 = vsyncadd [#allocation6], 4294959040  ;;  %v128_v0 = vld [vmem:[#allocation5 + $0x1e0] sm:$0xff]  ;;  %v129_v63 = vld [vmem:[#allocation5 + $0x1e8] sm:$0xff]  ;;  %s2544_s2 = smov [#allocation8]   ;;  %s2412_s5 = sshll.u32 %s4146_s3, 4  ;;  %s2413_s5 = int_to_ptr.hbm [resolvable:$true] %s2412_s5 }
  0x10   :  { %v124_v1 = vld [vmem:[#allocation5 + $0x1c0] sm:$0xff]  ;;  %v2577_v3 = vand.u32 4294901760, %v128_v0  ;;  %s2410_s29 = sshll.u32 %s2544_s2, 4  ;;  %s2411_s29 = int_to_ptr.vmem [resolvable:$true] %s2410_s29 }
  0x11   :  { %v120_v2 = vld [vmem:[#allocation5 + $0x1a0] sm:$0xff]  ;;  %v2579_v4 = vand.u32 4294901760, %v124_v1 }
  0x12   :  { %v2581_v5 = vand.u32 4294901760, %v120_v2  ;;  %v116_v6 = vld [vmem:[#allocation5 + $0x180] sm:$0xff]  ;;  %143 = vmatpush.msra.mxu0 %v2577_v3  ;;  %v2591_v14 = vsub.f32 %v128_v0, %v2577_v3  ;;  %458 = vmatpush.msra.mxu3 %v2577_v3 }
  0x13   :  { %v112_v7 = vld [vmem:[#allocation5 + $0x160] sm:$0xff]  ;;  %v2583_v9 = vand.u32 4294901760, %v116_v6  ;;  %v2594_v15 = vsub.f32 %v124_v1, %v2579_v4 }
  0x14   :  { %v108_v8 = vld [vmem:[#allocation5 + $0x140] sm:$0xff]  ;;  %v2585_v10 = vand.u32 4294901760, %v112_v7  ;;  %v2598_v16 = vsub.f32 %v120_v2, %v2581_v5  ;;  %145 = vmatpush.msra.mxu0 %v2579_v4  ;;  %370 = vmatpush.msra.mxu2 %v2591_v14  ;;  %v4160_v22 = vand.u32 4294901760, %v2591_v14 }
  0x15   :  { %v2587_v11 = vand.u32 4294901760, %v108_v8  ;;  %v104_v12 = vld [vmem:[#allocation5 + $0x120] sm:$0xff]  ;;  %v2603_v19 = vsub.f32 %v116_v6, %v2583_v9  ;;  %v4159_v23 = vand.u32 4294901760, %v2594_v15  ;;  %460 = vmatpush.msra.mxu3 %v2579_v4 }
  0x16   :  { %v100_v13 = vld [vmem:[#allocation5 + $0x100] sm:$0xff]  ;;  %v2600_v17 = vand.u32 4294901760, %v104_v12  ;;  %v2606_v20 = vsub.f32 %v112_v7, %v2585_v10  ;;  %v4158_v24 = vand.u32 4294901760, %v2598_v16  ;;  %147 = vmatpush.msra.mxu0 %v2581_v5  ;;  %373 = vmatpush.msra.mxu2 %v2594_v15  ;;  %v242_v30 = vsub.f32 %v2591_v14, %v4160_v22  ;;  %v109_v22 = vld [vmem:[#allocation5 + $0x148] sm:$0xff] }
  0x17   :  { %v96_v18 = vld [vmem:[#allocation5 + $0xe0] sm:$0xff]  ;;  %v2609_v21 = vsub.f32 %v108_v8, %v2587_v11  ;;  %v2616_v25 = vand.u32 4294901760, %v100_v13  ;;  %v4156_v27 = vand.u32 4294901760, %v2603_v19  ;;  %v248_v31 = vsub.f32 %v2594_v15, %v4159_v23  ;;  %462 = vmatpush.msra.mxu3 %v2581_v5 }
  0x18   :  { %v92_v26 = vld [vmem:[#allocation5 + $0xc0] sm:$0xff]  ;;  %v2620_v28 = vand.u32 4294901760, %v96_v18  ;;  %v2623_v29 = vsub.f32 %v104_v12, %v2600_v17  ;;  %v254_v32 = vsub.f32 %v2598_v16, %v4158_v24  ;;  %v4155_v33 = vand.u32 4294901760, %v2606_v20  ;;  %149 = vmatpush.msra.mxu0 %v2583_v9  ;;  %376 = vmatpush.msra.mxu2 %v2598_v16 }
  0x19   :  { %v2638_v34 = vand.u32 4294901760, %v92_v26  ;;  %v4154_v35 = vand.u32 4294901760, %v2609_v21  ;;  %v88_v36 = vld [vmem:[#allocation5 + $0xa0] sm:$0xff]  ;;  %v243_v37 = vand.u32 4294901760, %v242_v30  ;;  %v249_v38 = vand.u32 4294901760, %v248_v31  ;;  %464 = vmatpush.msra.mxu3 %v2583_v9 }
  0x1a   :  { %v260_v39 = vsub.f32 %v2603_v19, %v4156_v27  ;;  %v2647_v40 = vsub.f32 %v100_v13, %v2616_v25  ;;  %v4152_v41 = vand.u32 4294901760, %v2623_v29  ;;  %v2652_v42 = vsub.f32 %v96_v18, %v2620_v28  ;;  %v84_v43 = vld [vmem:[#allocation5 + $0x80] sm:$0xff]  ;;  %151 = vmatpush.msra.mxu0 %v2585_v10  ;;  %379 = vmatpush.msra.mxu2 %v2603_v19 }
  0x1b   :  { %244 = vmatpush.msra.mxu1 %v243_v37  ;;  %v255_v44 = vand.u32 4294901760, %v254_v32  ;;  %v266_v45 = vsub.f32 %v2606_v20, %v4155_v33  ;;  %v2658_v46 = vand.u32 4294901760, %v88_v36  ;;  %466 = vmatpush.msra.mxu3 %v2585_v10  ;;  %v272_v47 = vsub.f32 %v2609_v21, %v4154_v35  ;;  %v80_v49 = vld [vmem:[#allocation5 + $0x60] sm:$0xff]  ;;  %v61_v32 = vld [vmem:[#allocation2 + $0x8] sm:$0xff] }
  0x1c   :  { %v2666_v48 = vsub.f32 %v92_v26, %v2638_v34  ;;  %153 = vmatpush.msra.mxu0 %v2587_v11  ;;  %v261_v50 = vand.u32 4294901760, %v260_v39  ;;  %v2669_v51 = vand.u32 4294901760, %v84_v43  ;;  %v4151_v52 = vand.u32 4294901760, %v2647_v40  ;;  %382 = vmatpush.msra.mxu2 %v2606_v20  ;;  %v76_v55 = vld [vmem:[#allocation5 + $0x40] sm:$0xff] }
  0x1d   :  { %250 = vmatpush.msra.mxu1 %v249_v38  ;;  %468 = vmatpush.msra.mxu3 %v2587_v11  ;;  %v278_v53 = vsub.f32 %v2623_v29, %v4152_v41  ;;  %v4150_v54 = vand.u32 4294901760, %v2652_v42  ;;  %v60_v56 = vld [vmem:[#allocation2] sm:$0xff]  ;;  %v267_v57 = vand.u32 4294901760, %v266_v45  ;;  %v2679_v58 = vand.u32 4294901760, %v80_v49  ;;  %v113_v41 = vld [vmem:[#allocation5 + $0x168] sm:$0xff] }
  0x1e   :  { %155 = vmatpush.msra.mxu0 %v2600_v17  ;;  %v2682_v59 = vsub.f32 %v88_v36, %v2658_v46  ;;  %v72_v60 = vld [vmem:[#allocation5 + $0x20] sm:$0xff]  ;;  %385 = vmatpush.msra.mxu2 %v2609_v21  ;;  %v273_v61 = vand.u32 4294901760, %v272_v47  ;;  %v4149_v62 = vand.u32 4294901760, %v2666_v48  ;;  %v284_v0 = vsub.f32 %v2647_v40, %v4151_v52  ;;  %v125_v36 = vld [vmem:[#allocation5 + $0x1c8] sm:$0xff]  ;;  %v62_v52 = vld [vmem:[#allocation2 + $0x10] sm:$0xff] }
  0x1f   :  { %256 = vmatpush.msra.mxu1 %v255_v44  ;;  %470 = vmatpush.msra.mxu3 %v2600_v17  ;;  %v2691_v1 = vand.u32 4294901760, %v76_v55  ;;  %v2694_v2 = vsub.f32 %v84_v43, %v2669_v51  ;;  %v2696_v6 = vand.u32 4294901760, %v60_v56  ;;  %v279_v7 = vand.u32 4294901760, %v278_v53  ;;  %v68_v13 = vld [vmem:[#allocation5] sm:$0xff] }
  0x20   :  { %157 = vmatpush.msra.mxu0 %v2616_v25  ;;  %388 = vmatpush.msra.mxu2 %v2623_v29  ;;  %v290_v8 = vsub.f32 %v2652_v42, %v4150_v54  ;;  %v2703_v12 = vand.u32 4294901760, %v72_v60  ;;  %v4147_v18 = vand.u32 4294901760, %v2682_v59  ;;  %v2708_v26 = vsub.f32 %v80_v49, %v2679_v58 }
  0x21   :  { %262 = vmatpush.msra.mxu1 %v261_v50  ;;  %4270 = vst [vmem:[#allocation12_spill] sm:$0xff] %v2696_v6  ;;  %472 = vmatpush.msra.mxu3 %v2616_v25  ;;  %v2711_v30 = vsub.f32 %v60_v56, %v2696_v6  ;;  %v2713_v31 = vand.u32 4294901760, %v129_v63  ;;  %v296_v37 = vsub.f32 %v2666_v48, %v4149_v62  ;;  %v285_v38 = vand.u32 4294901760, %v284_v0 }
  0x22   :  { %4271 = vst [vmem:[#allocation13_spill] sm:$0xff] %v2703_v12  ;;  %159 = vmatpush.msra.mxu0 %v2620_v28  ;;  %391 = vmatpush.msra.mxu2 %v2647_v40  ;;  %v2721_v39 = vand.u32 4294901760, %v68_v13  ;;  %v4148_v43 = vand.u32 4294901760, %v2694_v2  ;;  %v2725_v44 = vsub.f32 %v76_v55, %v2691_v1  ;;  %v291_v45 = vand.u32 4294901760, %v290_v8 }
  0x23   :  { %268 = vmatpush.msra.mxu1 %v267_v57  ;;  %4272 = vst [vmem:[#allocation14_spill] sm:$0xff] %v2711_v30  ;;  %474 = vmatpush.msra.mxu3 %v2620_v28  ;;  %v2730_v47 = vand.u32 4294901760, %v2711_v30  ;;  %v2732_v49 = vand.u32 4294901760, %v61_v32  ;;  %v2734_v50 = vand.u32 4294901760, %v125_v36  ;;  %v302_v53 = vsub.f32 %v2682_v59, %v4147_v18  ;;  %v117_v18 = vld [vmem:[#allocation5 + $0x188] sm:$0xff] }
  0x24   :  { %161 = vmatpush.msra.mxu0 %v2638_v34  ;;  %4273 = vst [vmem:[#allocation15_spill] sm:$0xff] %v2721_v39  ;;  %394 = vmatpush.msra.mxu2 %v2652_v42  ;;  %v4153_v55 = vand.u32 4294901760, %v2708_v26  ;;  %v2742_v56 = vsub.f32 %v72_v60, %v2703_v12  ;;  %v2745_v57 = vsub.f32 %v129_v63, %v2713_v31  ;;  %v297_v0 = vand.u32 4294901760, %v296_v37 }
  0x25   :  { %274 = vmatpush.msra.mxu1 %v273_v61  ;;  %476 = vmatpush.msra.mxu3 %v2638_v34  ;;  %4274 = vst [vmem:[#allocation16_spill] sm:$0xff] %v2730_v47  ;;  %v121_v61 = vld [vmem:[#allocation5 + $0x1a8] sm:$0xff]  ;;  %v4157_v8 = vand.u32 4294901760, %v2725_v44  ;;  %v2755_v60 = vsub.f32 %v68_v13, %v2721_v39  ;;  %v2758_v63 = vsub.f32 %v125_v36, %v2734_v50  ;;  %v303_v13 = vand.u32 4294901760, %v302_v53 }
  0x26   :  { %4275 = vst [vmem:[#allocation17_spill] sm:$0xff] %v2732_v49  ;;  %163 = vmatpush.msra.mxu0 %v2658_v46  ;;  %397 = vmatpush.msra.mxu2 %v2666_v48  ;;  %v177_v37 = vsub.f32 %v2711_v30, %v2730_v47  ;;  %v314_v36 = vsub.f32 %v2708_v26, %v4153_v55  ;;  %v4162_v62 = vand.u32 4294901760, %v2742_v56  ;;  %v4161_v54 = vand.u32 4294901760, %v2745_v57 }
  0x27   :  { %280 = vmatpush.msra.mxu1 %v279_v7  ;;  %4276 = vst [vmem:[#allocation18_spill] sm:$0xff] %v2742_v56  ;;  %478 = vmatpush.msra.mxu3 %v2658_v46  ;;  %v308_v7 = vsub.f32 %v2694_v2, %v4148_v43  ;;  %v2767_v43 = vand.u32 4294901760, %v121_v61  ;;  %v320_v53 = vsub.f32 %v2725_v44, %v4157_v8  ;;  %v4166_v55 = vand.u32 4294901760, %v2755_v60 }
  0x28   :  { %4277 = vst [vmem:[#allocation19_spill] sm:$0xff] %v2745_v57  ;;  %165 = vmatpush.msra.mxu0 %v2669_v51  ;;  %400 = vmatpush.msra.mxu2 %v2682_v59  ;;  %v4167_v35 = vand.u32 4294901760, %v2758_v63  ;;  %v2786_v33 = vand.u32 4294901760, %v177_v37  ;;  %v315_v8 = vand.u32 4294901760, %v314_v36  ;;  %v326_v24 = vsub.f32 %v2742_v56, %v4162_v62  ;;  %v105_v62 = vld [vmem:[#allocation5 + $0x128] sm:$0xff] }
  0x29   :  { %286 = vmatpush.msra.mxu1 %v285_v38  ;;  %4278 = vst [vmem:[#allocation20_spill] sm:$0xff] %v2758_v63  ;;  %480 = vmatpush.msra.mxu3 %v2669_v51  ;;  %v2765_v38 = vsub.f32 %v61_v32, %v2732_v49  ;;  %v2777_v32 = vand.u32 4294901760, %v117_v18  ;;  %v800_v37 = vsub.f32 %v2745_v57, %v4161_v54  ;;  %v2804_v23 = vand.u32 4294901760, %v113_v41 }
  0x2a   :  { %167 = vmatpush.msra.mxu0 %v2679_v58  ;;  %403 = vmatpush.msra.mxu2 %v2694_v2  ;;  %4280 = vst [vmem:[#allocation22_spill] sm:$0xff] %v2786_v33  ;;  %v332_v36 = vsub.f32 %v2755_v60, %v4166_v55  ;;  %v806_v54 = vsub.f32 %v2758_v63, %v4167_v35  ;;  %v327_v55 = vand.u32 4294901760, %v326_v24  ;;  %v2835_v63 = vand.u32 4294901760, %v105_v62 }
  0x2b   :  { %4279 = vst [vmem:[#allocation21_spill] sm:$0xff] %v2765_v38  ;;  %292 = vmatpush.msra.mxu1 %v291_v45  ;;  %482 = vmatpush.msra.mxu3 %v2679_v58  ;;  %v309_v45 = vand.u32 4294901760, %v308_v7  ;;  %v2790_v27 = vand.u32 4294901760, %v2765_v38  ;;  %v2795_v7 = vand.u32 4294901760, %v62_v52  ;;  %v801_v35 = vand.u32 4294901760, %v800_v37 }
  0x2c   :  { %169 = vmatpush.msra.mxu0 %v2691_v1  ;;  %406 = vmatpush.msra.mxu2 %v2708_v26  ;;  %v807_v24 = vand.u32 4294901760, %v806_v54 }
  0x2d   :  { %298 = vmatpush.msra.mxu1 %v297_v0  ;;  %484 = vmatpush.msra.mxu3 %v2691_v1  ;;  %4281 = vst [vmem:[#allocation23_spill] sm:$0xff] %v2790_v27  ;;  %v2793_v0 = vsub.f32 %v121_v61, %v2767_v43  ;;  %v2809_v61 = vsub.f32 %v117_v18, %v2777_v32 }
  0x2e   :  { %4282 = vst [vmem:[#allocation24_spill] sm:$0xff] %v2795_v7  ;;  %171 = vmatpush.msra.mxu0 %v2703_v12  ;;  %409 = vmatpush.msra.mxu2 %v2725_v44  ;;  %v185_v18 = vsub.f32 %v2765_v38, %v2790_v27 }
  0x2f   :  { %304 = vmatpush.msra.mxu1 %v303_v13  ;;  %486 = vmatpush.msra.mxu3 %v2703_v12  ;;  %v321_v13 = vand.u32 4294901760, %v320_v53  ;;  %v63_v53 = vld [vmem:[#allocation2 + $0x18] sm:$0xff]  ;;  %v2826_v12 = vand.u32 4294901760, %v109_v22 }
  0x30   :  { %173 = vmatpush.msra.mxu0 %v2721_v39  ;;  %412 = vmatpush.msra.mxu2 %v2742_v56  ;;  %v2838_v56 = vand.u32 4294901760, %v63_v53  ;;  %v2843_v37 = vand.u32 4294901760, %v185_v18  ;;  %v4289_v18 = vand.u32 4294901760, %v2594_v15 }
  0x31   :  { %310 = vmatpush.msra.mxu1 %v309_v45  ;;  %179 = vmatmul.f32.vlgmr.msra.gmra.mxu0 %v2786_v33  ;;  %v2824_v45 = vsub.f32 %v62_v52, %v2795_v7  ;;  %v2830_v33 = vsub.f32 %v113_v41, %v2804_v23  ;;  %v101_v52 = vld [vmem:[#allocation5 + $0x108] sm:$0xff]  ;;  %v4285_v41 = vand.u32 4294901760, %v2591_v14 }
  0x32   :  { %488 = vmatpush.msra.mxu3 %v2721_v39  ;;  %415 = vmatpush.msra.mxu2 %v2755_v60  ;;  %4284 = vst [vmem:[#allocation26_spill] sm:$0xff] %v2838_v56  ;;  %v97_v14 = vld [vmem:[#allocation5 + $0xe8] sm:$0xff] }
  0x33   :  { %4283 = vst [vmem:[#allocation25_spill] sm:$0xff] %v2824_v45  ;;  %316 = vmatpush.msra.mxu1 %v315_v8  ;;  %492 = vmatmul.f32.vlgmr.msra.gmra.mxu3 %v2730_v47  ;;  %v333_v8 = vand.u32 4294901760, %v332_v36  ;;  %v4287_v47 = vand.u32 4294901760, %v2793_v0  ;;  %v2849_v39 = vand.u32 4294901760, %v2824_v45  ;;  %v4180_v54 = vand.u32 4294901760, %v2830_v33 }
  0x34   :  { %418 = vmatmul.f32.vlgmr.msra.gmra.mxu2 %v2711_v30  ;;  %541 = vmatpush.msrb.mxu0 %v4285_v41  ;;  %4286 = vst [vmem:[#allocation27_spill] sm:$0xff] %v2843_v37  ;;  %v2855_v36 = vand.u32 4294901760, %v101_v52  ;;  %v2864_v30 = vsub.f32 %v105_v62, %v2835_v63 }
  0x35   :  { %322 = vmatpush.msra.mxu1 %v321_v13  ;;  %701 = vmatpush.msrb.mxu2 %v2713_v31  ;;  %v812_v57 = vsub.f32 %v2793_v0, %v4287_v47  ;;  %4288 = vst [vmem:[#allocation28_spill] sm:$0xff] %v2849_v39  ;;  %v2852_v13 = vsub.f32 %v109_v22, %v2826_v12  ;;  %v4290_v47 = vand.u32 4294901760, %v2809_v61 }
  0x36   :  { %802 = vmatpush.msrb.mxu3 %v801_v35  ;;  %545 = vmatpush.msrb.mxu0 %v4289_v18  ;;  %v2867_v22 = vsub.f32 %v63_v53, %v2838_v56  ;;  %v193_v15 = vsub.f32 %v2824_v45, %v2849_v39  ;;  %v2874_v18 = vand.u32 4294901760, %v97_v14  ;;  %v824_v62 = vsub.f32 %v2830_v33, %v4180_v54  ;;  %v64_v53 = vld [vmem:[#allocation2 + $0x20] sm:$0xff]  ;;  %v89_v54 = vld [vmem:[#allocation5 + $0xa8] sm:$0xff] }
  0x37   :  { %328 = vmatpush.msra.mxu1 %v327_v55  ;;  %703 = vmatpush.msrb.mxu2 %v2734_v50  ;;  %v818_v41 = vsub.f32 %v2809_v61, %v4290_v47  ;;  %v813_v35 = vand.u32 4294901760, %v812_v57  ;;  %v93_v47 = vld [vmem:[#allocation5 + $0xc8] sm:$0xff]  ;;  %v4292_v57 = vand.u32 4294901760, %v2598_v16  ;;  %v4295_v16 = vand.u32 4294901760, %v2852_v13 }
  0x38   :  { %808 = vmatpush.msrb.mxu3 %v807_v24  ;;  %4291 = vst [vmem:[#allocation29_spill] sm:$0xff] %v2867_v22  ;;  %v2904_v55 = vsub.f32 %v97_v14, %v2874_v18 }
  0x39   :  { %334 = vmatpush.msra.mxu1 %v333_v8  ;;  %187 = vmatmul.f32.gmra.mxu0 %v2843_v37  ;;  %v2882_v8 = vsub.f32 %v101_v52, %v2855_v36  ;;  %v819_v24 = vand.u32 4294901760, %v818_v41  ;;  %v2888_v37 = vand.u32 4294901760, %v93_v47  ;;  %v2895_v52 = vand.u32 4294901760, %v193_v15 }
  0x3a   :  { %336 = vmatmul.f32.vlgmr.msra.gmra.mxu1 %v2696_v6  ;;  %705 = vmatpush.msrb.mxu2 %v2767_v43  ;;  %v830_v41 = vsub.f32 %v2852_v13, %v4295_v16  ;;  %v2910_v15 = vand.u32 4294901760, %v89_v54  ;;  %v4298_v16 = vand.u32 4294901760, %v2864_v30 }
  0x3b   :  { %636 = vmatpush.msrb.mxu1 %v2577_v3  ;;  %498 = vmatmul.f32.gmra.mxu3 %v2790_v27  ;;  %v2893_v3 = vand.u32 4294901760, %v2867_v22  ;;  %4294 = vst [vmem:[#allocation31_spill] sm:$0xff] %v2895_v52  ;;  %v825_v27 = vand.u32 4294901760, %v824_v62  ;;  %v2917_v14 = vsub.f32 %v93_v47, %v2888_v37  ;;  %v65_v47 = vld [vmem:[#allocation2 + $0x28] sm:$0xff] }
  0x3c   :  { %549 = vmatpush.msrb.mxu0 %v4292_v57  ;;  %423 = vmatmul.f32.gmra.mxu2 %v2765_v38  ;;  %v2901_v57 = vand.u32 4294901760, %v64_v53  ;;  %v836_v38 = vsub.f32 %v2864_v30, %v4298_v16  ;;  %v831_v62 = vand.u32 4294901760, %v830_v41  ;;  %v85_v16 = vld [vmem:[#allocation5 + $0x88] sm:$0xff] }
  0x3d   :  { %638 = vmatpush.msrb.mxu1 %v2579_v4  ;;  %4293 = vst [vmem:[#allocation30_spill] sm:$0xff] %v2893_v3  ;;  %814 = vmatpush.msrb.mxu3 %v813_v35  ;;  %v4297_v4 = vand.u32 4294901760, %v2603_v19  ;;  %v4185_v35 = vand.u32 4294901760, %v2882_v8  ;;  %v201_v19 = vsub.f32 %v2867_v22, %v2893_v3 }
  0x3e   :  { %707 = vmatpush.msrb.mxu2 %v2777_v32  ;;  %4296 = vst [vmem:[#allocation32_spill] sm:$0xff] %v2901_v57 }
  0x3f   :  { %640 = vmatpush.msrb.mxu1 %v2581_v5  ;;  %553 = vmatpush.msrb.mxu0 %v4297_v4  ;;  %v4299_v5 = vand.u32 4294901760, %v2606_v20  ;;  %v2935_v20 = vsub.f32 %v89_v54, %v2910_v15  ;;  %v81_v54 = vld [vmem:[#allocation5 + $0x68] sm:$0xff] }
  0x40   :  { %820 = vmatpush.msrb.mxu3 %v819_v24  ;;  %709 = vmatpush.msrb.mxu2 %v2804_v23  ;;  %v2927_v24 = vsub.f32 %v64_v53, %v2901_v57  ;;  %v837_v53 = vand.u32 4294901760, %v836_v38  ;;  %v4304_v38 = vand.u32 4294901760, %v2904_v55 }
  0x41   :  { %642 = vmatpush.msrb.mxu1 %v2583_v9  ;;  %557 = vmatpush.msrb.mxu0 %v4299_v5  ;;  %v842_v9 = vsub.f32 %v2882_v8, %v4185_v35  ;;  %v2937_v5 = vand.u32 4294901760, %v85_v16  ;;  %v2947_v35 = vand.u32 4294901760, %v65_v47 }
  0x42   :  { %195 = vmatmul.f32.gmra.mxu0 %v2895_v52  ;;  %340 = vmatmul.f32.gmra.mxu1 %v2732_v49  ;;  %4300 = vst [vmem:[#allocation33_spill] sm:$0xff] %v2927_v24  ;;  %v2951_v4 = vand.u32 4294901760, %v2927_v24  ;;  %v848_v41 = vsub.f32 %v2904_v55, %v4304_v38  ;;  %v4307_v52 = vand.u32 4294901760, %v2647_v40 }
  0x43   :  { %826 = vmatpush.msrb.mxu3 %v825_v27  ;;  %644 = vmatpush.msrb.mxu1 %v2585_v10  ;;  %v2943_v27 = vand.u32 4294901760, %v201_v19  ;;  %v4302_v10 = vand.u32 4294901760, %v2609_v21  ;;  %4303 = vst [vmem:[#allocation35_spill] sm:$0xff] %v2947_v35  ;;  %v2959_v19 = vand.u32 4294901760, %v81_v54  ;;  %v4305_v21 = vand.u32 4294901760, %v2623_v29 }
  0x44   :  { %504 = vmatmul.f32.gmra.mxu3 %v2849_v39  ;;  %711 = vmatpush.msrb.mxu2 %v2826_v12  ;;  %v2957_v39 = vsub.f32 %v85_v16, %v2937_v5  ;;  %v2976_v29 = vsub.f32 %v65_v47, %v2947_v35 }
  0x45   :  { %428 = vmatmul.f32.gmra.mxu2 %v2824_v45  ;;  %4301 = vst [vmem:[#allocation34_spill] sm:$0xff] %v2943_v27  ;;  %561 = vmatpush.msrb.mxu0 %v4302_v10  ;;  %v4306_v10 = vand.u32 4294901760, %v2917_v14  ;;  %v2970_v16 = vsub.f32 %v81_v54, %v2959_v19  ;;  %v77_v45 = vld [vmem:[#allocation5 + $0x48] sm:$0xff] }
  0x46   :  { %832 = vmatpush.msrb.mxu3 %v831_v62  ;;  %646 = vmatpush.msrb.mxu1 %v2587_v11  ;;  %v843_v62 = vand.u32 4294901760, %v842_v9  ;;  %v4192_v11 = vand.u32 4294901760, %v2935_v20  ;;  %4308 = vst [vmem:[#allocation36_spill] sm:$0xff] %v2976_v29  ;;  %v2978_v9 = vand.u32 4294901760, %v77_v45 }
  0x47   :  { %713 = vmatpush.msrb.mxu2 %v2835_v63  ;;  %565 = vmatpush.msrb.mxu0 %v4305_v21  ;;  %v854_v38 = vsub.f32 %v2917_v14, %v4306_v10  ;;  %v73_v21 = vld [vmem:[#allocation5 + $0x28] sm:$0xff] }
  0x48   :  { %838 = vmatpush.msrb.mxu3 %v837_v53  ;;  %648 = vmatpush.msrb.mxu1 %v2600_v17  ;;  %v209_v17 = vsub.f32 %v2927_v24, %v2951_v4  ;;  %v849_v53 = vand.u32 4294901760, %v848_v41  ;;  %v860_v40 = vsub.f32 %v2935_v20, %v4192_v11  ;;  %v2990_v47 = vsub.f32 %v77_v45, %v2978_v9 }
  0x49   :  { %715 = vmatpush.msrb.mxu2 %v2855_v36  ;;  %569 = vmatpush.msrb.mxu0 %v4307_v52  ;;  %v66_v52 = vld [vmem:[#allocation2 + $0x30] sm:$0xff]  ;;  %v2992_v10 = vand.u32 4294901760, %v73_v21  ;;  %v855_v41 = vand.u32 4294901760, %v854_v38  ;;  %v3001_v11 = vand.u32 4294901760, %v2976_v29  ;;  %v4312_v38 = vand.u32 4294901760, %v2957_v39 }
  0x4a   :  { %203 = vmatmul.f32.gmra.mxu0 %v2943_v27  ;;  %344 = vmatmul.f32.gmra.mxu1 %v2795_v7  ;;  %v3005_v27 = vand.u32 4294901760, %v209_v17  ;;  %v877_v17 = vand.u32 4294901760, %v2990_v47 }
  0x4b   :  { %844 = vmatpush.msrb.mxu3 %v843_v62  ;;  %650 = vmatpush.msrb.mxu1 %v2616_v25  ;;  %v69_v62 = vld [vmem:[#allocation5 + $0x8] sm:$0xff]  ;;  %v4309_v25 = vand.u32 4294901760, %v2652_v42  ;;  %v866_v54 = vsub.f32 %v2957_v39, %v4312_v38  ;;  %v4313_v42 = vand.u32 4294901760, %v2666_v48  ;;  %v217_v48 = vsub.f32 %v2976_v29, %v3001_v11 }
  0x4c   :  { %510 = vmatmul.f32.gmra.mxu3 %v2893_v3  ;;  %717 = vmatpush.msrb.mxu2 %v2874_v18  ;;  %v3003_v45 = vand.u32 4294901760, %v69_v62  ;;  %4310 = vst [vmem:[#allocation37_spill] sm:$0xff] %v3005_v27  ;;  %v3008_v3 = vand.u32 4294901760, %v66_v52 }
  0x4d   :  { %433 = vmatmul.f32.gmra.mxu2 %v2867_v22  ;;  %573 = vmatpush.msrb.mxu0 %v4309_v25  ;;  %v3014_v22 = vsub.f32 %v73_v21, %v2992_v10  ;;  %v861_v25 = vand.u32 4294901760, %v860_v40  ;;  %v4315_v21 = vand.u32 4294901760, %v2682_v59  ;;  %v867_v40 = vand.u32 4294901760, %v866_v54 }
  0x4e   :  { %850 = vmatpush.msrb.mxu3 %v849_v53  ;;  %652 = vmatpush.msrb.mxu1 %v2620_v28  ;;  %4311 = vst [vmem:[#allocation38_spill] sm:$0xff] %v3008_v3  ;;  %v4314_v28 = vand.u32 4294901760, %v2970_v16  ;;  %v3025_v38 = vsub.f32 %v69_v62, %v3003_v45  ;;  %v67_v62 = vld [vmem:[#allocation2 + $0x38] sm:$0xff]  ;;  %v878_v59 = vsub.f32 %v2990_v47, %v877_v17  ;;  %v4317_v54 = vand.u32 4294901760, %v2694_v2 }
  0x4f   :  { %719 = vmatpush.msrb.mxu2 %v2888_v37  ;;  %577 = vmatpush.msrb.mxu0 %v4313_v42 }
  0x50   :  { %856 = vmatpush.msrb.mxu3 %v855_v41  ;;  %654 = vmatpush.msrb.mxu1 %v2638_v34  ;;  %v872_v53 = vsub.f32 %v2970_v16, %v4314_v28  ;;  %v3035_v34 = vsub.f32 %v66_v52, %v3008_v3  ;;  %v883_v41 = vand.u32 4294901760, %v3014_v22  ;;  %v889_v28 = vand.u32 4294901760, %v3025_v38 }
  0x51   :  { %721 = vmatpush.msrb.mxu2 %v2910_v15  ;;  %581 = vmatpush.msrb.mxu0 %v4315_v21  ;;  %v3048_v52 = vand.u32 4294901760, %v217_v48  ;;  %v4320_v21 = vand.u32 4294901760, %v2708_v26  ;;  %v879_v2 = vand.u32 4294901760, %v878_v59  ;;  %v4322_v59 = vld [vmem:[#allocation18_spill] sm:$0xff] }
  0x52   :  { %211 = vmatmul.f32.gmra.mxu0 %v3005_v27  ;;  %348 = vmatmul.f32.gmra.mxu1 %v2838_v56  ;;  %4316 = vst [vmem:[#allocation39_spill] sm:$0xff] %v3035_v34  ;;  %v873_v42 = vand.u32 4294901760, %v872_v53  ;;  %v884_v53 = vsub.f32 %v3014_v22, %v883_v41  ;;  %v890_v48 = vsub.f32 %v3025_v38, %v889_v28 }
  0x53   :  { %862 = vmatpush.msrb.mxu3 %v861_v25  ;;  %656 = vmatpush.msrb.mxu1 %v2658_v46  ;;  %4318 = vst [vmem:[#allocation40_spill] sm:$0xff] %v3048_v52  ;;  %v3051_v46 = vand.u32 4294901760, %v3035_v34  ;;  %v3054_v25 = vand.u32 4294901760, %v67_v62 }
  0x54   :  { %516 = vmatmul.f32.gmra.mxu3 %v2951_v4  ;;  %723 = vmatpush.msrb.mxu2 %v2937_v5 }
  0x55   :  { %438 = vmatmul.f32.gmra.mxu2 %v2927_v24  ;;  %585 = vmatpush.msrb.mxu0 %v4317_v54  ;;  %4319 = vst [vmem:[#allocation41_spill] sm:$0xff] %v3054_v25  ;;  %v225_v26 = vsub.f32 %v3035_v34, %v3051_v46 }
  0x56   :  { %868 = vmatpush.msrb.mxu3 %v867_v40  ;;  %658 = vmatpush.msrb.mxu1 %v2669_v51  ;;  %v4321_v51 = vand.u32 4294901760, %v2725_v44  ;;  %v3074_v40 = vsub.f32 %v67_v62, %v3054_v25  ;;  %v891_v44 = vand.u32 4294901760, %v890_v48  ;;  %v4325_v62 = vld [vmem:[#allocation13_spill] sm:$0xff] }
  0x57   :  { %725 = vmatpush.msrb.mxu2 %v2959_v19  ;;  %589 = vmatpush.msrb.mxu0 %v4320_v21  ;;  %v3082_v54 = vand.u32 4294901760, %v225_v26 }
  0x58   :  { %874 = vmatpush.msrb.mxu3 %v873_v42  ;;  %660 = vmatpush.msrb.mxu1 %v2679_v58  ;;  %v885_v58 = vand.u32 4294901760, %v884_v53  ;;  %v4323_v42 = vand.u32 4294901760, %v4322_v59  ;;  %v3085_v21 = vand.u32 4294901760, %v3074_v40  ;;  %v4327_v53 = vld [vmem:[#allocation15_spill] sm:$0xff] }
  0x59   :  { %727 = vmatpush.msrb.mxu2 %v2978_v9  ;;  %593 = vmatpush.msrb.mxu0 %v4321_v51  ;;  %4324 = vst [vmem:[#allocation18_spill] sm:$0xff] %v3082_v54 }
  0x5a   :  { %219 = vmatmul.f32.gmra.mxu0 %v3048_v52  ;;  %352 = vmatmul.f32.gmra.mxu1 %v2901_v57  ;;  %v233_v51 = vsub.f32 %v3074_v40, %v3085_v21 }
  0x5b   :  { %880 = vmatpush.msrb.mxu3 %v879_v2  ;;  %662 = vmatpush.msrb.mxu1 %v2691_v1  ;;  %v4326_v1 = vand.u32 4294901760, %v2755_v60  ;;  %v4328_v2 = vld [vmem:[#allocation19_spill] sm:$0xff]  ;;  %v4330_v60 = vld [vmem:[#allocation20_spill] sm:$0xff] }
  0x5c   :  { %522 = vmatmul.f32.gmra.mxu3 %v3001_v11  ;;  %729 = vmatpush.msrb.mxu2 %v2992_v10  ;;  %v4329_v48 = vand.u32 4294901760, %v4328_v2  ;;  %v4331_v26 = vand.u32 4294901760, %v4330_v60 }
  0x5d   :  { %443 = vmatmul.f32.gmra.mxu2 %v2976_v29  ;;  %597 = vmatpush.msrb.mxu0 %v4323_v42  ;;  %v114_v42 = vld [vmem:[#allocation5 + $0x170] sm:$0xff] }
  0x5e   :  { %886 = vmatpush.msrb.mxu3 %v885_v58  ;;  %664 = vmatpush.msrb.mxu1 %v4325_v62  ;;  %v3106_v58 = vand.u32 4294901760, %v233_v51 }
  0x5f   :  { %601 = vmatpush.msrb.mxu0 %v4326_v1  ;;  %731 = vmatpush.msrb.mxu2 %v3003_v45  ;;  %v3255_v1 = vand.u32 4294901760, %v114_v42 }
  0x60   :  { %892 = vmatpush.msrb.mxu3 %v891_v44  ;;  %666 = vmatpush.msrb.mxu1 %v4327_v53  ;;  %4332 = vst [vmem:[#allocation13_spill] sm:$0xff] %v3106_v58  ;;  %v4333_v44 = vand.u32 4294901760, %v2793_v0 }
  0x61   :  { %1099 = vmatpush.msra.mxu2 %v4329_v48  ;;  %928 = vmatpush.msra.mxu0 %v4328_v2  ;;  %v3260_v2 = vsub.f32 %v114_v42, %v3255_v1 }
  0x62   :  { %227 = vmatmul.f32.gmra.mxu0 %v3082_v54  ;;  %356 = vmatmul.f32.gmra.mxu1 %v2947_v35 }
  0x63   :  { %1194 = vmatpush.msra.mxu3 %v2713_v31  ;;  %1016 = vmatpush.msra.mxu1 %v2713_v31  ;;  %v4334_v31 = vand.u32 4294901760, %v2809_v61  ;;  %v4202_v51 = vand.u32 4294901760, %v3260_v2 }
  0x64   :  { %528 = vmatmul.f32.gmra.mxu3 %v3051_v46  ;;  %1103 = vmatpush.msra.mxu2 %v4331_v26 }
  0x65   :  { %448 = vmatmul.f32.gmra.mxu2 %v3035_v34  ;;  %931 = vmatpush.msra.mxu0 %v4330_v60  ;;  %v110_v60 = vld [vmem:[#allocation5 + $0x150] sm:$0xff] }
  0x66   :  { %1196 = vmatpush.msra.mxu3 %v2734_v50  ;;  %1018 = vmatpush.msra.mxu1 %v2734_v50  ;;  %v4335_v50 = vand.u32 4294901760, %v2830_v33 }
  0x67   :  { %1107 = vmatpush.msra.mxu2 %v4333_v44  ;;  %934 = vmatpush.msra.mxu0 %v2793_v0  ;;  %v4343_v0 = vld [vmem:[#allocation27_spill] sm:$0xff]  ;;  %v3271_v44 = vand.u32 4294901760, %v110_v60 }
  0x68   :  { %1198 = vmatpush.msra.mxu3 %v2767_v43  ;;  %1020 = vmatpush.msra.mxu1 %v2767_v43  ;;  %v4336_v43 = vand.u32 4294901760, %v2852_v13 }
  0x69   :  { %1111 = vmatpush.msra.mxu2 %v4334_v31  ;;  %937 = vmatpush.msra.mxu0 %v2809_v61  ;;  %v4344_v61 = vand.u32 4294901760, %v2957_v39  ;;  %v1382_v31 = vsub.f32 %v3260_v2, %v4202_v51 }
  0x6a   :  { %235 = vmatmul.f32.gmra.mxu0 %v3106_v58  ;;  %360 = vmatmul.f32.gmra.mxu1 %v3008_v3 }
  0x6b   :  { %1200 = vmatpush.msra.mxu3 %v2777_v32  ;;  %1022 = vmatpush.msra.mxu1 %v2777_v32  ;;  %v4337_v32 = vand.u32 4294901760, %v2864_v30 }
  0x6c   :  { %534 = vmatmul.f32.gmra.mxu3 %v3085_v21  ;;  %1115 = vmatpush.msra.mxu2 %v4335_v50  ;;  %v3279_v50 = vsub.f32 %v110_v60, %v3271_v44 }
  0x6d   :  { %453 = vmatmul.f32.gmra.mxu2 %v3074_v40  ;;  %940 = vmatpush.msra.mxu0 %v2830_v33  ;;  %v4339_v33 = vld [vmem:[#allocation22_spill] sm:$0xff] }
  0x6e   :  { %1202 = vmatpush.msra.mxu3 %v2804_v23  ;;  %1024 = vmatpush.msra.mxu1 %v2804_v23  ;;  %v4338_v23 = vand.u32 4294901760, %v2882_v8 }
  0x6f   :  { %1119 = vmatpush.msra.mxu2 %v4336_v43  ;;  %943 = vmatpush.msra.mxu0 %v2852_v13  ;;  %v4347_v13 = vld [vmem:[#allocation34_spill] sm:$0xff] }
  0x70   :  { %1204 = vmatpush.msra.mxu3 %v2826_v12  ;;  %1026 = vmatpush.msra.mxu1 %v2826_v12  ;;  %v4340_v12 = vand.u32 4294901760, %v2904_v55  ;;  %v106_v43 = vld [vmem:[#allocation5 + $0x130] sm:$0xff] }
  0x71   :  { %1123 = vmatpush.msra.mxu2 %v4337_v32  ;;  %946 = vmatpush.msra.mxu0 %v2864_v30  ;;  %v4341_v30 = vand.u32 4294901760, %v2917_v14  ;;  %v1383_v32 = vand.u32 4294901760, %v1382_v31 }
  0x72   :  { %364 = vmatmul.f32.gmra.mxu1 %v3054_v25  ;;  %603 = vmatmul.f32.vlgmr.msrb.gmra.mxu0 %v2696_v6 }
  0x73   :  { %1206 = vmatpush.msra.mxu3 %v2835_v63  ;;  %1028 = vmatpush.msra.mxu1 %v2835_v63  ;;  %v4342_v63 = vand.u32 4294901760, %v2935_v20 }
  0x74   :  { %894 = vmatmul.f32.vlgmr.msrb.gmra.mxu3 %v2696_v6  ;;  %1127 = vmatpush.msra.mxu2 %v4338_v23  ;;  %v3283_v23 = vand.u32 4294901760, %v106_v43 }
  0x75   :  { %737 = vmatmul.f32.vlgmr.msrb.gmra.mxu2 %v4339_v33  ;;  %949 = vmatpush.msra.mxu0 %v2882_v8  ;;  %v126_v8 = vld [vmem:[#allocation5 + $0x1d0] sm:$0xff] }
  0x76   :  { %1208 = vmatpush.msra.mxu3 %v2855_v36  ;;  %1030 = vmatpush.msra.mxu1 %v2855_v36  ;;  %v130_v36 = vld [vmem:[#allocation5 + $0x1f0] sm:$0xff] }
  0x77   :  { %1131 = vmatpush.msra.mxu2 %v4340_v12  ;;  %952 = vmatpush.msra.mxu0 %v2904_v55 }
  0x78   :  { %1210 = vmatpush.msra.mxu3 %v2874_v18  ;;  %1032 = vmatpush.msra.mxu1 %v2874_v18 }
  0x79   :  { %1135 = vmatpush.msra.mxu2 %v4341_v30  ;;  %955 = vmatpush.msra.mxu0 %v2917_v14  ;;  %v4201_v30 = vand.u32 4294901760, %v3279_v50 }
  0x7a   :  { %607 = vmatmul.f32.gmra.mxu0 %v2732_v49  ;;  %668 = vmatmul.f32.vlgmr.msrb.gmra.mxu1 %v2696_v6 }
  0x7b   :  { %1212 = vmatpush.msra.mxu3 %v2888_v37  ;;  %1034 = vmatpush.msra.mxu1 %v2888_v37  ;;  %v4345_v37 = vand.u32 4294901760, %v2970_v16 }
  0x7c   :  { %898 = vmatmul.f32.gmra.mxu3 %v2732_v49  ;;  %1139 = vmatpush.msra.mxu2 %v4342_v63  ;;  %v3290_v63 = vsub.f32 %v106_v43, %v3283_v23 }
  0x7d   :  { %745 = vmatmul.f32.gmra.mxu2 %v4343_v0  ;;  %958 = vmatpush.msra.mxu0 %v2935_v20 }
  0x7e   :  { %1214 = vmatpush.msra.mxu3 %v2910_v15  ;;  %1036 = vmatpush.msra.mxu1 %v2910_v15  ;;  %v3215_v15 = vand.u32 4294901760, %v126_v8 }
  0x7f   :  { %1143 = vmatpush.msra.mxu2 %v4344_v61  ;;  %961 = vmatpush.msra.mxu0 %v2957_v39  ;;  %v4346_v39 = vld [vmem:[#allocation31_spill] sm:$0xff]  ;;  %v1388_v61 = vsub.f32 %v3279_v50, %v4201_v30 }
  0x80   :  { %1216 = vmatpush.msra.mxu3 %v2937_v5  ;;  %1038 = vmatpush.msra.mxu1 %v2937_v5  ;;  %v3223_v20 = vsub.f32 %v126_v8, %v3215_v15  ;;  %v122_v5 = vld [vmem:[#allocation5 + $0x1b0] sm:$0xff] }
  0x81   :  { %1147 = vmatpush.msra.mxu2 %v4345_v37  ;;  %964 = vmatpush.msra.mxu0 %v2970_v16  ;;  %v3227_v16 = vand.u32 4294901760, %v122_v5  ;;  %v4348_v37 = vld [vmem:[#allocation14_spill] sm:$0xff] }
  0x82   :  { %611 = vmatmul.f32.gmra.mxu0 %v2795_v7  ;;  %672 = vmatmul.f32.gmra.mxu1 %v2732_v49  ;;  %v102_v8 = vld [vmem:[#allocation5 + $0x110] sm:$0xff] }
  0x83   :  { %1218 = vmatpush.msra.mxu3 %v2959_v19  ;;  %1040 = vmatpush.msra.mxu1 %v2959_v19 }
  0x84   :  { %902 = vmatmul.f32.gmra.mxu3 %v2795_v7  ;;  %1151 = vmatpush.msra.mxu2 %v877_v17  ;;  %v118_v17 = vld [vmem:[#allocation5 + $0x190] sm:$0xff] }
  0x85   :  { %753 = vmatmul.f32.gmra.mxu2 %v4346_v39  ;;  %967 = vmatpush.msra.mxu0 %v2990_v47  ;;  %v3232_v47 = vsub.f32 %v122_v5, %v3227_v16  ;;  %v3301_v5 = vand.u32 4294901760, %v102_v8  ;;  %v4358_v39 = vld [vmem:[#allocation29_spill] sm:$0xff] }
  0x86   :  { %1220 = vmatpush.msra.mxu3 %v2978_v9  ;;  %1042 = vmatpush.msra.mxu1 %v2978_v9  ;;  %v4206_v9 = vand.u32 4294901760, %v3223_v20 }
  0x87   :  { %1155 = vmatpush.msra.mxu2 %v883_v41  ;;  %970 = vmatpush.msra.mxu0 %v3014_v22  ;;  %v3204_v22 = vand.u32 4294901760, %v130_v36  ;;  %v3243_v41 = vand.u32 4294901760, %v118_v17 }
  0x88   :  { %1222 = vmatpush.msra.mxu3 %v2992_v10  ;;  %1044 = vmatpush.msra.mxu1 %v2992_v10  ;;  %v1364_v10 = vsub.f32 %v3223_v20, %v4206_v9  ;;  %v4352_v9 = vld [vmem:[#allocation25_spill] sm:$0xff] }
  0x89   :  { %973 = vmatpush.msra.mxu0 %v3025_v38  ;;  %1159 = vmatpush.msra.mxu2 %v889_v28  ;;  %v3207_v55 = vsub.f32 %v130_v36, %v3204_v22  ;;  %v3251_v59 = vsub.f32 %v118_v17, %v3243_v41  ;;  %v4200_v36 = vand.u32 4294901760, %v3290_v63  ;;  %v98_v17 = vld [vmem:[#allocation5 + $0xf0] sm:$0xff] }
  0x8a   :  { %615 = vmatmul.f32.gmra.mxu0 %v2838_v56  ;;  %676 = vmatmul.f32.gmra.mxu1 %v2795_v7  ;;  %v1365_v38 = vand.u32 4294901760, %v1364_v10  ;;  %v3309_v10 = vsub.f32 %v102_v8, %v3301_v5 }
  0x8b   :  { %1224 = vmatpush.msra.mxu3 %v3003_v45  ;;  %1046 = vmatpush.msra.mxu1 %v3003_v45  ;;  %v4207_v18 = vand.u32 4294901760, %v3207_v55  ;;  %v4205_v45 = vand.u32 4294901760, %v3232_v47  ;;  %v4203_v53 = vand.u32 4294901760, %v3251_v59 }
  0x8c   :  { %906 = vmatmul.f32.gmra.mxu3 %v2838_v56  ;;  %1259 = vmatpush.msrb.mxu0 %v3204_v22 }
  0x8d   :  { %761 = vmatmul.f32.gmra.mxu2 %v4347_v13  ;;  %1574 = vmatpush.msrb.mxu3 %v3204_v22  ;;  %v1358_v14 = vsub.f32 %v3207_v55, %v4207_v18  ;;  %v1370_v28 = vsub.f32 %v3232_v47, %v4205_v45  ;;  %v1376_v48 = vsub.f32 %v3251_v59, %v4203_v53  ;;  %v4353_v18 = vld [vmem:[#allocation23_spill] sm:$0xff] }
  0x8e   :  { %1486 = vmatpush.msrb.mxu2 %v3207_v55  ;;  %1261 = vmatpush.msrb.mxu0 %v3215_v15 }
  0x8f   :  { %v1359_v19 = vand.u32 4294901760, %v1358_v14  ;;  %1576 = vmatpush.msrb.mxu3 %v3215_v15  ;;  %v1371_v62 = vand.u32 4294901760, %v1370_v28  ;;  %v1377_v26 = vand.u32 4294901760, %v1376_v48  ;;  %v1389_v14 = vand.u32 4294901760, %v1388_v61  ;;  %v4350_v61 = vld [vmem:[#allocation16_spill] sm:$0xff] }
  0x90   :  { %1489 = vmatpush.msrb.mxu2 %v3223_v20  ;;  %1263 = vmatpush.msrb.mxu0 %v3227_v16  ;;  %v3313_v28 = vand.u32 4294901760, %v98_v17  ;;  %v4199_v48 = vand.u32 4294901760, %v3309_v10 }
  0x91   :  { %1360 = vmatpush.msrb.mxu1 %v1359_v19  ;;  %1578 = vmatpush.msrb.mxu3 %v3227_v16  ;;  %v1394_v19 = vsub.f32 %v3290_v63, %v4200_v36  ;;  %v90_v36 = vld [vmem:[#allocation5 + $0xb0] sm:$0xff] }
  0x92   :  { %619 = vmatmul.f32.gmra.mxu0 %v2901_v57  ;;  %680 = vmatmul.f32.gmra.mxu1 %v2838_v56  ;;  %v3326_v31 = vsub.f32 %v98_v17, %v3313_v28  ;;  %v1400_v43 = vsub.f32 %v3309_v10, %v4199_v48 }
  0x93   :  { %1492 = vmatpush.msrb.mxu2 %v3232_v47  ;;  %1366 = vmatpush.msrb.mxu1 %v1365_v38  ;;  %v1395_v38 = vand.u32 4294901760, %v1394_v19 }
  0x94   :  { %910 = vmatmul.f32.gmra.mxu3 %v2901_v57  ;;  %1265 = vmatpush.msrb.mxu0 %v3243_v41  ;;  %v4204_v8 = vand.u32 4294901760, %v3326_v31  ;;  %v1401_v19 = vand.u32 4294901760, %v1400_v43  ;;  %v3349_v43 = vand.u32 4294901760, %v90_v36 }
  0x95   :  { %769 = vmatmul.f32.gmra.mxu2 %v3005_v27  ;;  %1580 = vmatpush.msrb.mxu3 %v3243_v41  ;;  %v82_v27 = vld [vmem:[#allocation5 + $0x70] sm:$0xff] }
  0x96   :  { %1495 = vmatpush.msrb.mxu2 %v3251_v59  ;;  %1372 = vmatpush.msrb.mxu1 %v1371_v62 }
  0x97   :  { %1267 = vmatpush.msrb.mxu0 %v3255_v1  ;;  %1582 = vmatpush.msrb.mxu3 %v3255_v1 }
  0x98   :  { %1498 = vmatpush.msrb.mxu2 %v3260_v2  ;;  %1378 = vmatpush.msrb.mxu1 %v1377_v26 }
  0x99   :  { %1269 = vmatpush.msrb.mxu0 %v3271_v44  ;;  %1584 = vmatpush.msrb.mxu3 %v3271_v44 }
  0x9a   :  { %623 = vmatmul.f32.gmra.mxu0 %v2947_v35  ;;  %684 = vmatmul.f32.gmra.mxu1 %v2901_v57 }
  0x9b   :  { %1501 = vmatpush.msrb.mxu2 %v3279_v50  ;;  %1384 = vmatpush.msrb.mxu1 %v1383_v32  ;;  %v4349_v32 = vld [vmem:[#allocation21_spill] sm:$0xff] }
  0x9c   :  { %914 = vmatmul.f32.gmra.mxu3 %v2947_v35  ;;  %1271 = vmatpush.msrb.mxu0 %v3283_v23 }
  0x9d   :  { %777 = vmatmul.f32.gmra.mxu2 %v3048_v52  ;;  %1586 = vmatpush.msrb.mxu3 %v3283_v23 }
  0x9e   :  { %1504 = vmatpush.msrb.mxu2 %v3290_v63  ;;  %1390 = vmatpush.msrb.mxu1 %v1389_v14  ;;  %v94_v14 = vld [vmem:[#allocation5 + $0xd0] sm:$0xff] }
  0x9f   :  { %1273 = vmatpush.msrb.mxu0 %v3301_v5  ;;  %1588 = vmatpush.msrb.mxu3 %v3301_v5  ;;  %v3337_v17 = vand.u32 4294901760, %v94_v14 }
  0xa0   :  { %1507 = vmatpush.msrb.mxu2 %v3309_v10  ;;  %1396 = vmatpush.msrb.mxu1 %v1395_v38  ;;  %v1406_v38 = vsub.f32 %v3326_v31, %v4204_v8 }
  0xa1   :  { %1275 = vmatpush.msrb.mxu0 %v3313_v28  ;;  %1590 = vmatpush.msrb.mxu3 %v3313_v28  ;;  %v3345_v48 = vsub.f32 %v94_v14, %v3337_v17 }
  0xa2   :  { %627 = vmatmul.f32.gmra.mxu0 %v3008_v3  ;;  %688 = vmatmul.f32.gmra.mxu1 %v2947_v35  ;;  %v1407_v30 = vand.u32 4294901760, %v1406_v38  ;;  %v3362_v38 = vsub.f32 %v90_v36, %v3349_v43 }
  0xa3   :  { %1510 = vmatpush.msrb.mxu2 %v3326_v31  ;;  %1402 = vmatpush.msrb.mxu1 %v1401_v19  ;;  %v4214_v8 = vand.u32 4294901760, %v3345_v48 }
  0xa4   :  { %918 = vmatmul.f32.gmra.mxu3 %v3008_v3  ;;  %1277 = vmatpush.msrb.mxu0 %v3337_v17 }
  0xa5   :  { %785 = vmatmul.f32.gmra.mxu2 %v3082_v54  ;;  %1592 = vmatpush.msrb.mxu3 %v3337_v17  ;;  %v1412_v45 = vsub.f32 %v3345_v48, %v4214_v8  ;;  %v86_v54 = vld [vmem:[#allocation5 + $0x90] sm:$0xff] }
  0xa6   :  { %1513 = vmatpush.msrb.mxu2 %v3345_v48  ;;  %1408 = vmatpush.msrb.mxu1 %v1407_v30  ;;  %v3373_v30 = vand.u32 4294901760, %v86_v54 }
  0xa7   :  { %1279 = vmatpush.msrb.mxu0 %v3349_v43  ;;  %1594 = vmatpush.msrb.mxu3 %v3349_v43  ;;  %v1413_v52 = vand.u32 4294901760, %v1412_v45  ;;  %v3385_v45 = vand.u32 4294901760, %v82_v27 }
  0xa8   :  { %1516 = vmatpush.msrb.mxu2 %v3362_v38  ;;  %v3381_v8 = vsub.f32 %v86_v54, %v3373_v30 }
  0xa9   :  { %1414 = vmatpush.msrb.mxu1 %v1413_v52  ;;  %1281 = vmatpush.msrb.mxu0 %v3373_v30 }
  0xaa   :  { %631 = vmatmul.f32.gmra.mxu0 %v3054_v25  ;;  %692 = vmatmul.f32.gmra.mxu1 %v3008_v3 }
  0xab   :  { %1596 = vmatpush.msrb.mxu3 %v3373_v30  ;;  %1519 = vmatpush.msrb.mxu2 %v3381_v8 }
  0xac   :  { %922 = vmatmul.f32.gmra.mxu3 %v3054_v25  ;;  %1283 = vmatpush.msrb.mxu0 %v3385_v45 }
  0xad   :  { %793 = vmatmul.f32.gmra.mxu2 %v3106_v58  ;;  %v4219_v58 = vand.u32 4294901760, %v3362_v38  ;;  %1598 = vmatpush.msrb.mxu3 %v3385_v45 }
  0xae   :  { %v3285_v12 = vpop.f32.mrf.mxu0 }
  0xaf   :  { %v1418_v36 = vsub.f32 %v3362_v38, %v4219_v58  ;;  %v4222_v58 = vand.u32 4294901760, %v3381_v8 }
  0xb1   :  { %v1419_v13 = vand.u32 4294901760, %v1418_v36  ;;  %v3398_v36 = vsub.f32 %v82_v27, %v3385_v45 }
  0xb2   :  { %696 = vmatmul.f32.gmra.mxu1 %v3054_v25  ;;  %976 = vmatmul.f32.vlgmr.msra.gmra.mxu0 %v4348_v37 }
  0xb3   :  { %1420 = vmatpush.msrb.mxu1 %v1419_v13  ;;  %1522 = vmatpush.msrb.mxu2 %v3398_v36 }
  0xb4   :  { %1226 = vmatmul.f32.vlgmr.msra.gmra.mxu3 %v2696_v6 }
  0xb5   :  { %1161 = vmatmul.f32.vlgmr.msra.gmra.mxu2 %v2696_v6 }
  0xb6   :  { %v3315_v42 = vpop.f32.mrf.mxu0  ;;  %v3323_v26 = vpop.f32.mrf.mxu3 }
  0xb7   :  { %v3317_v62 = vpop.f32.mrf.mxu1  ;;  %v3321_v60 = vpop.f32.mrf.mxu2 }
  0xba   :  { %981 = vmatmul.f32.gmra.mxu0 %v4349_v32  ;;  %1050 = vmatmul.f32.vlgmr.msra.gmra.mxu1 %v4350_v61  ;;  %v78_v32 = vld [vmem:[#allocation5 + $0x50] sm:$0xff] }
  0xbb   :  { %v3409_v27 = vand.u32 4294901760, %v78_v32 }
  0xbc   :  { %1230 = vmatmul.f32.gmra.mxu3 %v2732_v49 }
  0xbd   :  { %1165 = vmatmul.f32.gmra.mxu2 %v2732_v49  ;;  %4360 = vst [vmem:[#allocation44_spill] sm:$0xff] %v3409_v27  ;;  %1285 = vmatpush.msrb.mxu0 %v3409_v27 }
  0xbe   :  { %v3359_v14 = vpop.f32.mrf.mxu3  ;;  %1600 = vmatpush.msrb.mxu3 %v3409_v27 }
  0xbf   :  { %v3351_v51 = vpop.f32.mrf.mxu0  ;;  %v3353_v53 = vpop.f32.mrf.mxu1  ;;  %4351 = vst [vmem:[#allocation15_spill] sm:$0xff] %v3359_v14 }
  0xc0   :  { %v3357_v19 = vpop.f32.mrf.mxu2 }
  0xc2   :  { %986 = vmatmul.f32.gmra.mxu0 %v4352_v9  ;;  %1056 = vmatmul.f32.gmra.mxu1 %v4353_v18  ;;  %v70_v18 = vld [vmem:[#allocation5 + $0x10] sm:$0xff] }
  0xc4   :  { %1234 = vmatmul.f32.gmra.mxu3 %v2795_v7 }
  0xc5   :  { %1169 = vmatmul.f32.gmra.mxu2 %v2795_v7  ;;  %v1424_v7 = vsub.f32 %v3381_v8, %v4222_v58  ;;  %v74_v58 = vld [vmem:[#allocation5 + $0x30] sm:$0xff] }
  0xc7   :  { %v3387_v9 = vpop.f32.mrf.mxu0  ;;  %v3389_v49 = vpop.f32.mrf.mxu1 }
  0xc8   :  { %4354 = vst [vmem:[#allocation19_spill] sm:$0xff] %v3387_v9  ;;  %v3393_v52 = vpop.f32.mrf.mxu2  ;;  %v3395_v54 = vpop.f32.mrf.mxu3  ;;  %v4359_v9 = vld [vmem:[#allocation28_spill] sm:$0xff] }
  0xc9   :  { %4355 = vst [vmem:[#allocation20_spill] sm:$0xff] %v3389_v49 }
  0xca   :  { %4356 = vst [vmem:[#allocation42_spill] sm:$0xff] %v3393_v52  ;;  %991 = vmatmul.f32.gmra.mxu0 %v4358_v39  ;;  %1062 = vmatmul.f32.gmra.mxu1 %v4359_v9  ;;  %v4223_v52 = vand.u32 4294901760, %v3398_v36  ;;  %v3417_v39 = vsub.f32 %v78_v32, %v3409_v27  ;;  %v3419_v9 = vand.u32 4294901760, %v74_v58  ;;  %v3432_v32 = vand.u32 4294901760, %v70_v18 }
  0xcb   :  { %4357 = vst [vmem:[#allocation43_spill] sm:$0xff] %v3395_v54  ;;  %v1425_v54 = vand.u32 4294901760, %v1424_v7 }
  0xcc   :  { %1238 = vmatmul.f32.gmra.mxu3 %v2838_v56  ;;  %v1430_v13 = vsub.f32 %v3398_v36, %v4223_v52  ;;  %4361 = vst [vmem:[#allocation45_spill] sm:$0xff] %v3419_v9  ;;  %1525 = vmatpush.msrb.mxu2 %v3417_v39  ;;  %v4226_v52 = vand.u32 4294901760, %v3417_v39 }
  0xcd   :  { %1173 = vmatmul.f32.gmra.mxu2 %v2838_v56  ;;  %1426 = vmatpush.msrb.mxu1 %v1425_v54  ;;  %v3430_v54 = vsub.f32 %v74_v58, %v3419_v9 }
  0xce   :  { %v1431_v7 = vand.u32 4294901760, %v1430_v13  ;;  %1287 = vmatpush.msrb.mxu0 %v3419_v9  ;;  %1602 = vmatpush.msrb.mxu3 %v3419_v9  ;;  %v4368_v9 = vand.u32 4294901760, %v3223_v20  ;;  %v127_v20 = vld [vmem:[#allocation5 + $0x1d8] sm:$0xff] }
  0xcf   :  { %v3423_v49 = vpop.f32.mrf.mxu0  ;;  %v3425_v14 = vpop.f32.mrf.mxu1  ;;  %1528 = vmatpush.msrb.mxu2 %v3430_v54  ;;  %v4229_v58 = vand.u32 4294901760, %v3430_v54 }
  0xd0   :  { %4362 = vst [vmem:[#allocation46_spill] sm:$0xff] %v3423_v49  ;;  %v3434_v56 = vpop.f32.mrf.mxu2  ;;  %v3436_v13 = vpop.f32.mrf.mxu3  ;;  %1432 = vmatpush.msrb.mxu1 %v1431_v7  ;;  %v1436_v49 = vsub.f32 %v3417_v39, %v4226_v52  ;;  %1289 = vmatpush.msrb.mxu0 %v3432_v32 }
  0xd1   :  { %4363 = vst [vmem:[#allocation47_spill] sm:$0xff] %v3425_v14  ;;  %v3446_v14 = vsub.f32 %v70_v18, %v3432_v32  ;;  %v1442_v52 = vsub.f32 %v3430_v54, %v4229_v58  ;;  %v4367_v18 = vand.u32 4294901760, %v3207_v55  ;;  %1604 = vmatpush.msrb.mxu3 %v3432_v32 }
  0xd2   :  { %4364 = vst [vmem:[#allocation48_spill] sm:$0xff] %v3434_v56  ;;  %996 = vmatmul.f32.gmra.mxu0 %v2927_v24  ;;  %v4366_v56 = vld [vmem:[#allocation30_spill] sm:$0xff]  ;;  %v1437_v7 = vand.u32 4294901760, %v1436_v49 }
  0xd3   :  { %4365 = vst [vmem:[#allocation49_spill] sm:$0xff] %v3436_v13  ;;  %1068 = vmatmul.f32.gmra.mxu1 %v4366_v56  ;;  %1531 = vmatpush.msrb.mxu2 %v3446_v14  ;;  %v4232_v13 = vand.u32 4294901760, %v3446_v14  ;;  %v1443_v24 = vand.u32 4294901760, %v1442_v52  ;;  %v131_v56 = vld [vmem:[#allocation5 + $0x1f8] sm:$0xff] }
  0xd4   :  { %1242 = vmatmul.f32.gmra.mxu3 %v2901_v57  ;;  %1657 = vmatpush.msra.mxu0 %v4367_v18  ;;  %v3464_v58 = vand.u32 4294901760, %v131_v56 }
  0xd5   :  { %1177 = vmatmul.f32.gmra.mxu2 %v2901_v57  ;;  %1438 = vmatpush.msrb.mxu1 %v1437_v7  ;;  %v1448_v49 = vsub.f32 %v3446_v14, %v4232_v13  ;;  %v4369_v57 = vand.u32 4294901760, %v3232_v47  ;;  %v123_v47 = vld [vmem:[#allocation5 + $0x1b8] sm:$0xff] }
  0xd6   :  { %1661 = vmatpush.msra.mxu0 %v4368_v9  ;;  %1817 = vmatpush.msra.mxu2 %v3464_v58  ;;  %v3478_v13 = vsub.f32 %v131_v56, %v3464_v58  ;;  %v3486_v9 = vand.u32 4294901760, %v127_v20 }
  0xd7   :  { %v3468_v27 = vpop.f32.mrf.mxu0  ;;  %v3470_v55 = vpop.f32.mrf.mxu1  ;;  %1444 = vmatpush.msrb.mxu1 %v1443_v24  ;;  %v1449_v18 = vand.u32 4294901760, %v1448_v49  ;;  %v4370_v49 = vand.u32 4294901760, %v3251_v59  ;;  %v4371_v59 = vand.u32 4294901760, %v3260_v2 }
  0xd8   :  { %v3472_v7 = vpop.f32.mrf.mxu2  ;;  %v3474_v52 = vpop.f32.mrf.mxu3  ;;  %1665 = vmatpush.msra.mxu0 %v4369_v57  ;;  %v4237_v24 = vand.u32 4294901760, %v3478_v13  ;;  %v3496_v57 = vsub.f32 %v127_v20, %v3486_v9  ;;  %1819 = vmatpush.msra.mxu2 %v3486_v9 }
  0xd9   :  { %1450 = vmatpush.msrb.mxu1 %v1449_v18  ;;  %v3500_v18 = vand.u32 4294901760, %v123_v47 }
  0xda   :  { %1001 = vmatmul.f32.gmra.mxu0 %v2976_v29  ;;  %v1916_v56 = vsub.f32 %v3478_v13, %v4237_v24  ;;  %v4240_v24 = vand.u32 4294901760, %v3496_v57 }
  0xdb   :  { %1074 = vmatmul.f32.gmra.mxu1 %v2951_v4  ;;  %1669 = vmatpush.msra.mxu0 %v4370_v49 }
  0xdc   :  { %1752 = vmatpush.msra.mxu1 %v3204_v22  ;;  %1246 = vmatmul.f32.gmra.mxu3 %v2947_v35  ;;  %v1917_v22 = vand.u32 4294901760, %v1916_v56  ;;  %v3515_v56 = vld [vmem:[#allocation7] sm:$0xf]  ;;  %v1922_v2 = vsub.f32 %v3496_v57, %v4240_v24  ;;  %v4375_v24 = vand.u32 4294901760, %v3290_v63 }
  0xdd   :  { %1181 = vmatmul.f32.gmra.mxu2 %v2947_v35  ;;  %1673 = vmatpush.msra.mxu0 %v4371_v59  ;;  %4373 = vst [vmem:[#allocation51_spill] sm:$0xff] %v3515_v56  ;;  %v4374_v59 = vand.u32 4294901760, %v3279_v50 }
  0xde   :  { %1754 = vmatpush.msra.mxu1 %v3215_v15  ;;  %1918 = vmatpush.msra.mxu3 %v1917_v22  ;;  %v119_v22 = vld [vmem:[#allocation5 + $0x198] sm:$0xff]  ;;  %v1923_v35 = vand.u32 4294901760, %v1922_v2 }
  0xdf   :  { %v3504_v49 = vpop.f32.mrf.mxu0  ;;  %v3506_v29 = vpop.f32.mrf.mxu1  ;;  %1821 = vmatpush.msra.mxu2 %v3500_v18  ;;  %1677 = vmatpush.msra.mxu0 %v4374_v59  ;;  %v115_v2 = vld [vmem:[#allocation5 + $0x178] sm:$0xff] }
  0xe0   :  { %1756 = vmatpush.msra.mxu1 %v3227_v16  ;;  %v3510_v20 = vpop.f32.mrf.mxu2  ;;  %v3512_v15 = vpop.f32.mrf.mxu3  ;;  %v3526_v16 = vsub.f32 %v123_v47, %v3500_v18  ;;  %1924 = vmatpush.msra.mxu3 %v1923_v35  ;;  %v3546_v63 = vand.u32 4294901760, %v115_v2 }
  0xe1   :  { %4372 = vst [vmem:[#allocation50_spill] sm:$0xff] %v3512_v15  ;;  %v3528_v15 = vand.u32 4294901760, %v119_v22  ;;  %1681 = vmatpush.msra.mxu0 %v4375_v24 }
  0xe2   :  { %1758 = vmatpush.msra.mxu1 %v3243_v41  ;;  %1006 = vmatmul.f32.gmra.mxu0 %v3035_v34  ;;  %v3534_v41 = vperm.slane %v3515_v56, 0  ;;  %v4245_v50 = vand.u32 4294901760, %v3526_v16 }
  0xe3   :  { %1080 = vmatmul.f32.gmra.mxu1 %v3001_v11  ;;  %v3540_v47 = vsub.f32 %v119_v22, %v3528_v15  ;;  %1823 = vmatpush.msra.mxu2 %v3528_v15  ;;  %v4377_v22 = vand.u32 4294901760, %v3309_v10  ;;  %v111_v10 = vld [vmem:[#allocation5 + $0x158] sm:$0xff] }
  0xe4   :  { %1760 = vmatpush.msra.mxu1 %v3255_v1  ;;  %1250 = vmatmul.f32.gmra.mxu3 %v3008_v3  ;;  %v1928_v1 = vsub.f32 %v3526_v16, %v4245_v50  ;;  %v181_v56 = vadd.f32 %v3285_v12, %v3534_v41  ;;  %v3572_v12 = vsub.f32 %v115_v2, %v3546_v63 }
  0xe5   :  { %1185 = vmatmul.f32.gmra.mxu2 %v3008_v3  ;;  %v4249_v35 = vand.u32 4294901760, %v3540_v47  ;;  %1685 = vmatpush.msra.mxu0 %v4377_v22  ;;  %v3574_v22 = vand.u32 4294901760, %v111_v10 }
  0xe6   :  { %1762 = vmatpush.msra.mxu1 %v3271_v44  ;;  %v1929_v34 = vand.u32 4294901760, %v1928_v1  ;;  %1825 = vmatpush.msra.mxu2 %v3546_v63 }
  0xe7   :  { %v3549_v24 = vpop.f32.mrf.mxu0  ;;  %v3551_v59 = vpop.f32.mrf.mxu1  ;;  %v1934_v44 = vsub.f32 %v3540_v47, %v4249_v35  ;;  %v3584_v2 = vsub.f32 %v111_v10, %v3574_v22  ;;  %v189_v10 = vadd.f32 %v3315_v42, %v3534_v41 }
  0xe8   :  { %4376 = vst [vmem:[#allocation52_spill] sm:$0xff] %v3549_v24  ;;  %v3558_v3 = vpop.f32.mrf.mxu2  ;;  %v3560_v50 = vpop.f32.mrf.mxu3  ;;  %1764 = vmatpush.msra.mxu1 %v3283_v23  ;;  %v4378_v24 = vand.u32 4294901760, %v3326_v31  ;;  %1930 = vmatpush.msra.mxu3 %v1929_v34  ;;  %v338_v23 = vadd.f32 %v3317_v62, %v181_v56  ;;  %v4248_v31 = vand.u32 4294901760, %v3572_v12  ;;  %v107_v34 = vld [vmem:[#allocation5 + $0x138] sm:$0xff] }
  0xe9   :  { %v1935_v1 = vand.u32 4294901760, %v1934_v44  ;;  %1827 = vmatpush.msra.mxu2 %v3574_v22  ;;  %v3590_v62 = vand.u32 4294901760, %v107_v34  ;;  %v4254_v44 = vand.u32 4294901760, %v3584_v2 }
  0xea   :  { %1689 = vmatpush.msra.mxu0 %v4378_v24  ;;  %1766 = vmatpush.msra.mxu1 %v3301_v5  ;;  %v4379_v24 = vand.u32 4294901760, %v3345_v48  ;;  %v1940_v5 = vsub.f32 %v3572_v12, %v4248_v31 }
  0xeb   :  { %1011 = vmatmul.f32.gmra.mxu0 %v3074_v40  ;;  %1086 = vmatmul.f32.gmra.mxu1 %v3051_v46  ;;  %v3615_v42 = vsub.f32 %v107_v34, %v3590_v62  ;;  %v99_v34 = vld [vmem:[#allocation5 + $0xf8] sm:$0xff] }
  0xec   :  { %1254 = vmatmul.f32.gmra.mxu3 %v3054_v25  ;;  %1693 = vmatpush.msra.mxu0 %v4379_v24  ;;  %v420_v24 = vadd.f32 %v3321_v60, %v338_v23  ;;  %v103_v60 = vld [vmem:[#allocation5 + $0x118] sm:$0xff] }
  0xed   :  { %1189 = vmatmul.f32.gmra.mxu2 %v3054_v25  ;;  %1936 = vmatpush.msra.mxu3 %v1935_v1  ;;  %v4380_v1 = vand.u32 4294901760, %v3362_v38  ;;  %v1941_v25 = vand.u32 4294901760, %v1940_v5  ;;  %v4381_v38 = vand.u32 4294901760, %v3381_v8  ;;  %v3617_v5 = vand.u32 4294901760, %v103_v60 }
  0xee   :  { %1768 = vmatpush.msra.mxu1 %v3313_v28  ;;  %1829 = vmatpush.msra.mxu2 %v3590_v62  ;;  %v1946_v28 = vsub.f32 %v3584_v2, %v4254_v44  ;;  %v4252_v8 = vand.u32 4294901760, %v3615_v42 }
  0xef   :  { %v3593_v56 = vpop.f32.mrf.mxu1  ;;  %v604_v48 = vpop.f32.mrf.mxu0  ;;  %1697 = vmatpush.msra.mxu0 %v4380_v1  ;;  %1942 = vmatpush.msra.mxu3 %v1941_v25  ;;  %v342_v1 = vadd.f32 %v3353_v53, %v189_v10  ;;  %v3628_v25 = vsub.f32 %v103_v60, %v3617_v5  ;;  %v3634_v53 = vand.u32 4294901760, %v99_v34 }
  0xf0   :  { %v3601_v31 = vpop.f32.mrf.mxu2  ;;  %v3603_v35 = vpop.f32.mrf.mxu3  ;;  %1770 = vmatpush.msra.mxu1 %v3337_v17  ;;  %v1947_v23 = vand.u32 4294901760, %v1946_v28  ;;  %v494_v17 = vadd.f32 %v3323_v26, %v420_v24  ;;  %v1952_v26 = vsub.f32 %v3615_v42, %v4252_v8  ;;  %1831 = vmatpush.msra.mxu2 %v3617_v5  ;;  %v4383_v24 = vand.u32 4294901760, %v3417_v39 }
  0xf1   :  { %1701 = vmatpush.msra.mxu0 %v4381_v38  ;;  %v4382_v38 = vand.u32 4294901760, %v3398_v36  ;;  %v4253_v10 = vand.u32 4294901760, %v3628_v25  ;;  %v425_v60 = vadd.f32 %v3357_v19, %v342_v1  ;;  %v95_v19 = vld [vmem:[#allocation5 + $0xd8] sm:$0xff] }
  0xf2   :  { %1772 = vmatpush.msra.mxu1 %v3349_v43  ;;  %1948 = vmatpush.msra.mxu3 %v1947_v23  ;;  %v605_v28 = vadd.f32 %v604_v48, %v494_v17  ;;  %v197_v48 = vadd.f32 %v3351_v51, %v3534_v41  ;;  %v1953_v8 = vand.u32 4294901760, %v1952_v26  ;;  %v3657_v51 = vsub.f32 %v99_v34, %v3634_v53  ;;  %v4388_v26 = vld [vmem:[#allocation15_spill] sm:$0xff]  ;;  %v4392_v34 = vld [vmem:[#allocation21_spill] sm:$0xff] }
  0xf3   :  { %1092 = vmatmul.f32.gmra.mxu1 %v3085_v21  ;;  %1295 = vmatmul.f32.vlgmr.msrb.gmra.mxu0 %v4339_v33  ;;  %v1958_v39 = vsub.f32 %v3628_v25, %v4253_v10  ;;  %v4391_v10 = vand.u32 4294901760, %v3446_v14 }
  0xf4   :  { %1608 = vmatmul.f32.vlgmr.msrb.gmra.mxu3 %v4350_v61  ;;  %1705 = vmatpush.msra.mxu0 %v4382_v38 }
  0xf5   :  { %1534 = vmatmul.f32.vlgmr.msrb.gmra.mxu2 %v4348_v37  ;;  %1774 = vmatpush.msra.mxu1 %v3373_v30  ;;  %v4386_v30 = vand.u32 4294901760, %v3430_v54  ;;  %v1959_v1 = vand.u32 4294901760, %v1958_v39  ;;  %v91_v39 = vld [vmem:[#allocation5 + $0xb8] sm:$0xff] }
  0xf6   :  { %1709 = vmatpush.msra.mxu0 %v4383_v24  ;;  %1833 = vmatpush.msra.mxu2 %v3634_v53  ;;  %v4389_v24 = vld [vmem:[#allocation20_spill] sm:$0xff] }
  0xf7   :  { %v608_v43 = vpop.f32.mrf.mxu0  ;;  %v669_v36 = vpop.f32.mrf.mxu1  ;;  %1776 = vmatpush.msra.mxu1 %v3385_v45  ;;  %1954 = vmatpush.msra.mxu3 %v1953_v8  ;;  %v4387_v45 = vld [vmem:[#allocation44_spill] sm:$0xff]  ;;  %v346_v54 = vadd.f32 %v4389_v24, %v197_v48  ;;  %v3676_v48 = vand.u32 4294901760, %v91_v39 }
  0xf8   :  { %v670_v23 = vadd.f32 %v669_v36, %v605_v28  ;;  %v3643_v17 = vpop.f32.mrf.mxu2  ;;  %v3645_v38 = vpop.f32.mrf.mxu3  ;;  %1713 = vmatpush.msra.mxu0 %v4386_v30  ;;  %v3659_v28 = vand.u32 4294901760, %v95_v19  ;;  %v500_v36 = vadd.f32 %v4388_v26, %v425_v60  ;;  %v4390_v30 = vld [vmem:[#allocation23_spill] sm:$0xff] }
  0xf9   :  { %4384 = vst [vmem:[#allocation53_spill] sm:$0xff] %v3643_v17  ;;  %1778 = vmatpush.msra.mxu1 %v4387_v45  ;;  %1960 = vmatpush.msra.mxu3 %v1959_v1  ;;  %v4393_v45 = vld [vmem:[#allocation45_spill] sm:$0xff] }
  0xfa   :  { %4385 = vst [vmem:[#allocation54_spill] sm:$0xff] %v3645_v38  ;;  %1717 = vmatpush.msra.mxu0 %v4391_v10  ;;  %v3670_v8 = vsub.f32 %v95_v19, %v3659_v28  ;;  %v609_v44 = vadd.f32 %v608_v43, %v500_v36  ;;  %1835 = vmatpush.msra.mxu2 %v3659_v28  ;;  %v4394_v19 = vld [vmem:[#allocation19_spill] sm:$0xff]  ;;  %v4395_v43 = vld [vmem:[#allocation42_spill] sm:$0xff] }
  0xfb   :  { %2374 = vst [vmem:[#allocation8] sm:$0xff] %v670_v23  ;;  %1303 = vmatmul.f32.gmra.mxu0 %v4343_v0  ;;  %1452 = vmatmul.f32.vlgmr.msrb.gmra.mxu1 %v2696_v6  ;;  %v4255_v23 = vand.u32 4294901760, %v3657_v51  ;;  %v205_v1 = vadd.f32 %v4394_v19, %v3534_v41  ;;  %v430_v36 = vadd.f32 %v4395_v43, %v346_v54  ;;  %v4398_v54 = vld [vmem:[#allocation31_spill] sm:$0xff]  ;;  %v4402_v0 = vld [vmem:[#allocation28_spill] sm:$0xff]  ;;  %v4411_v6 = vld [vmem:[#allocation30_spill] sm:$0xff] }
  0xfc   :  { %1614 = vmatmul.f32.gmra.mxu3 %v4390_v30  ;;  %1780 = vmatpush.msra.mxu1 %v4393_v45  ;;  %v4257_v26 = vand.u32 4294901760, %v3670_v8  ;;  %v4400_v43 = vld [vmem:[#allocation43_spill] sm:$0xff] }
  0xfd   :  { %1539 = vmatmul.f32.gmra.mxu2 %v4392_v34  ;;  %v1964_v60 = vsub.f32 %v3657_v51, %v4255_v23  ;;  %2044 = vmatpush.msrb.mxu0 %v3478_v13  ;;  %v4401_v34 = vld [vmem:[#allocation47_spill] sm:$0xff] }
  0xfe   :  { %1837 = vmatpush.msra.mxu2 %v3676_v48  ;;  %1782 = vmatpush.msra.mxu1 %v3432_v32  ;;  %v1970_v45 = vsub.f32 %v3670_v8, %v4257_v26  ;;  %v506_v26 = vadd.f32 %v4400_v43, %v430_v36  ;;  %v350_v37 = vadd.f32 %v4401_v34, %v205_v1 }
  0xff   :  { %v612_v14 = vpop.f32.mrf.mxu0  ;;  %v673_v10 = vpop.f32.mrf.mxu1  ;;  %v1965_v61 = vand.u32 4294901760, %v1964_v60  ;;  %2047 = vmatpush.msrb.mxu0 %v3496_v57  ;;  %v87_v60 = vld [vmem:[#allocation5 + $0x98] sm:$0xff] }
 0x100   :  { %v674_v24 = vadd.f32 %v673_v10, %v609_v44  ;;  %v3684_v30 = vpop.f32.mrf.mxu2  ;;  %v3686_v23 = vpop.f32.mrf.mxu3  ;;  %2132 = vmatpush.msrb.mxu1 %v3464_v58  ;;  %v4399_v44 = vld [vmem:[#allocation17_spill] sm:$0xff]  ;;  %v3698_v10 = vsub.f32 %v91_v39, %v3676_v48  ;;  %v1971_v19 = vand.u32 4294901760, %v1970_v45  ;;  %v3700_v32 = vand.u32 4294901760, %v87_v60  ;;  %v83_v39 = vld [vmem:[#allocation5 + $0x78] sm:$0xff] }
 0x101   :  { %4396 = vst [vmem:[#allocation44_spill] sm:$0xff] %v3684_v30  ;;  %1966 = vmatpush.msra.mxu3 %v1965_v61  ;;  %2050 = vmatpush.msrb.mxu0 %v3526_v16  ;;  %v613_v45 = vadd.f32 %v612_v14, %v506_v26  ;;  %v3716_v34 = vand.u32 4294901760, %v83_v39  ;;  %v4405_v14 = vld [vmem:[#allocation48_spill] sm:$0xff]  ;;  %v79_v30 = vld [vmem:[#allocation5 + $0x58] sm:$0xff] }
 0x102   :  { %4397 = vst [vmem:[#allocation15_spill] sm:$0xff] %v3686_v23  ;;  %2134 = vmatpush.msrb.mxu1 %v3486_v9  ;;  %v3710_v61 = vsub.f32 %v87_v60, %v3700_v32  ;;  %1839 = vmatpush.msra.mxu2 %v3700_v32  ;;  %v4404_v60 = vld [vmem:[#allocation46_spill] sm:$0xff]  ;;  %v435_v26 = vadd.f32 %v4405_v14, %v350_v37 }
 0x103   :  { %2378 = vst [vmem:[#allocation8 + $0x20] sm:$0xff] %v674_v24  ;;  %1311 = vmatmul.f32.gmra.mxu0 %v4398_v54  ;;  %1456 = vmatmul.f32.gmra.mxu1 %v4399_v44  ;;  %v4260_v24 = vand.u32 4294901760, %v3698_v10  ;;  %v4403_v54 = vld [vmem:[#allocation25_spill] sm:$0xff]  ;;  %v3734_v38 = vsub.f32 %v83_v39, %v3716_v34  ;;  %v4408_v37 = vld [vmem:[#allocation34_spill] sm:$0xff] }
 0x104   :  { %1620 = vmatmul.f32.gmra.mxu3 %v4402_v0  ;;  %2136 = vmatpush.msrb.mxu1 %v3500_v18  ;;  %v4262_v0 = vand.u32 4294901760, %v3710_v61  ;;  %v4410_v39 = vld [vmem:[#allocation49_spill] sm:$0xff] }
 0x105   :  { %1544 = vmatmul.f32.gmra.mxu2 %v4403_v54  ;;  %1972 = vmatpush.msra.mxu3 %v1971_v19  ;;  %v1976_v36 = vsub.f32 %v3698_v10, %v4260_v24  ;;  %v213_v19 = vadd.f32 %v4404_v60, %v3534_v41  ;;  %v3736_v60 = vand.u32 4294901760, %v79_v30  ;;  %v4265_v14 = vand.u32 4294901760, %v3734_v38 }
 0x106   :  { %2053 = vmatpush.msrb.mxu0 %v3540_v47  ;;  %1841 = vmatpush.msra.mxu2 %v3716_v34  ;;  %v1982_v33 = vsub.f32 %v3710_v61, %v4262_v0 }
 0x107   :  { %v616_v1 = vpop.f32.mrf.mxu0  ;;  %v677_v43 = vpop.f32.mrf.mxu1  ;;  %v1977_v44 = vand.u32 4294901760, %v1976_v36  ;;  %2138 = vmatpush.msrb.mxu1 %v3528_v15  ;;  %v75_v36 = vld [vmem:[#allocation5 + $0x38] sm:$0xff]  ;;  %v3744_v0 = vsub.f32 %v79_v30, %v3736_v60 }
 0x108   :  { %v678_v54 = vadd.f32 %v677_v43, %v613_v45  ;;  %v3724_v23 = vpop.f32.mrf.mxu2  ;;  %v3726_v24 = vpop.f32.mrf.mxu3  ;;  %2056 = vmatpush.msrb.mxu0 %v3572_v12  ;;  %v4409_v45 = vld [vmem:[#allocation24_spill] sm:$0xff]  ;;  %v1983_v43 = vand.u32 4294901760, %v1982_v33  ;;  %1843 = vmatpush.msra.mxu2 %v3736_v60  ;;  %v1988_v33 = vsub.f32 %v3734_v38, %v4265_v14 }
 0x109   :  { %4406 = vst [vmem:[#allocation20_spill] sm:$0xff] %v3724_v23  ;;  %1978 = vmatpush.msra.mxu3 %v1977_v44  ;;  %v354_v23 = vadd.f32 %v3470_v55, %v213_v19  ;;  %2140 = vmatpush.msrb.mxu1 %v3546_v63  ;;  %v4413_v44 = vld [vmem:[#allocation29_spill] sm:$0xff]  ;;  %v4266_v30 = vand.u32 4294901760, %v3744_v0 }
 0x10a   :  { %4407 = vst [vmem:[#allocation45_spill] sm:$0xff] %v3726_v24  ;;  %v512_v24 = vadd.f32 %v4410_v39, %v435_v26  ;;  %2059 = vmatpush.msrb.mxu0 %v3584_v2 }
 0x10b   :  { %2382 = vst [vmem:[#allocation8 + $0x40] sm:$0xff] %v678_v54  ;;  %1319 = vmatmul.f32.gmra.mxu0 %v4408_v37  ;;  %1460 = vmatmul.f32.gmra.mxu1 %v4409_v45  ;;  %v3749_v54 = vand.u32 4294901760, %v75_v36  ;;  %v71_v37 = vld [vmem:[#allocation5 + $0x18] sm:$0xff] }
 0x10c   :  { %1626 = vmatmul.f32.gmra.mxu3 %v4411_v6  ;;  %v3757_v45 = vand.u32 4294901760, %v71_v37  ;;  %v617_v26 = vadd.f32 %v616_v1, %v512_v24  ;;  %v1989_v6 = vand.u32 4294901760, %v1988_v33  ;;  %2142 = vmatpush.msrb.mxu1 %v3574_v22  ;;  %v221_v24 = vadd.f32 %v3468_v27, %v3534_v41  ;;  %v4415_v27 = vld [vmem:[#allocation37_spill] sm:$0xff] }
 0x10d   :  { %4412 = vst [vmem:[#allocation19_spill] sm:$0xff] %v3749_v54  ;;  %1549 = vmatmul.f32.gmra.mxu2 %v4413_v44  ;;  %1984 = vmatpush.msra.mxu3 %v1983_v43  ;;  %v3761_v55 = vsub.f32 %v75_v36, %v3749_v54  ;;  %v1994_v43 = vsub.f32 %v3744_v0, %v4266_v30 }
 0x10e   :  { %1845 = vmatpush.msra.mxu2 %v3749_v54  ;;  %v3768_v14 = vsub.f32 %v71_v37, %v3757_v45  ;;  %v440_v1 = vadd.f32 %v3472_v7, %v354_v23  ;;  %2062 = vmatpush.msrb.mxu0 %v3615_v42  ;;  %v4414_v54 = vand.u32 4294901760, %v3478_v13  ;;  %v4416_v7 = vld [vmem:[#allocation26_spill] sm:$0xff] }
 0x10f   :  { %v620_v19 = vpop.f32.mrf.mxu0  ;;  %v681_v39 = vpop.f32.mrf.mxu1  ;;  %v1999_v33 = vand.u32 4294901760, %v3761_v55  ;;  %1990 = vmatpush.msra.mxu3 %v1989_v6  ;;  %v1995_v37 = vand.u32 4294901760, %v1994_v43  ;;  %2144 = vmatpush.msrb.mxu1 %v3590_v62  ;;  %v4418_v43 = vld [vmem:[#allocation33_spill] sm:$0xff] }
 0x110   :  { %v682_v36 = vadd.f32 %v681_v39, %v617_v26  ;;  %v3774_v44 = vpop.f32.mrf.mxu2  ;;  %v3776_v17 = vpop.f32.mrf.mxu3  ;;  %1847 = vmatpush.msra.mxu2 %v3757_v45  ;;  %v4269_v30 = vand.u32 4294901760, %v3768_v14  ;;  %v4417_v26 = vand.u32 4294901760, %v3496_v57  ;;  %v518_v13 = vadd.f32 %v3474_v52, %v440_v1  ;;  %2065 = vmatpush.msrb.mxu0 %v3628_v25 }
 0x111   :  { %v2000_v23 = vsub.f32 %v3761_v55, %v1999_v33  ;;  %1996 = vmatpush.msra.mxu3 %v1995_v37  ;;  %2146 = vmatpush.msrb.mxu1 %v3617_v5 }
 0x112   :  { %2215 = vmatpush.msrb.mxu2 %v4414_v54  ;;  %2386 = vst [vmem:[#allocation8 + $0x60] sm:$0xff] %v682_v36  ;;  %v2006_v6 = vsub.f32 %v3768_v14, %v4269_v30  ;;  %v358_v54 = vadd.f32 %v3506_v29, %v221_v24  ;;  %v621_v37 = vadd.f32 %v620_v19, %v518_v13  ;;  %v4419_v30 = vand.u32 4294901760, %v3526_v16  ;;  %v4422_v19 = vld [vmem:[#allocation32_spill] sm:$0xff] }
 0x113   :  { %1327 = vmatmul.f32.gmra.mxu0 %v4415_v27  ;;  %1464 = vmatmul.f32.gmra.mxu1 %v4416_v7  ;;  %v2001_v39 = vand.u32 4294901760, %v2000_v23  ;;  %v229_v29 = vadd.f32 %v3504_v49, %v3534_v41  ;;  %v4420_v16 = vand.u32 4294901760, %v3540_v47  ;;  %v4423_v49 = vand.u32 4294901760, %v3572_v12 }
 0x114   :  { %2219 = vmatpush.msrb.mxu2 %v4417_v26  ;;  %1632 = vmatmul.f32.gmra.mxu3 %v2951_v4  ;;  %v2007_v36 = vand.u32 4294901760, %v2006_v6  ;;  %v445_v52 = vadd.f32 %v3510_v20, %v358_v54  ;;  %v4424_v20 = vld [vmem:[#allocation50_spill] sm:$0xff]  ;;  %v4426_v54 = vand.u32 4294901760, %v3584_v2  ;;  %v4428_v2 = vand.u32 4294901760, %v3615_v42 }
 0x115   :  { %1554 = vmatmul.f32.gmra.mxu2 %v4418_v43  ;;  %2002 = vmatpush.msra.mxu3 %v2001_v39  ;;  %v362_v13 = vadd.f32 %v3551_v59, %v229_v29  ;;  %v4427_v59 = vld [vmem:[#allocation52_spill] sm:$0xff] }
 0x116   :  { %2223 = vmatpush.msrb.mxu2 %v4419_v30  ;;  %2068 = vmatpush.msrb.mxu0 %v3657_v51  ;;  %v4421_v30 = vld [vmem:[#allocation40_spill] sm:$0xff]  ;;  %v524_v6 = vadd.f32 %v4424_v20, %v445_v52  ;;  %v237_v39 = vadd.f32 %v4427_v59, %v3534_v41  ;;  %v4430_v41 = vld [vmem:[#allocation35_spill] sm:$0xff]  ;;  %v4433_v52 = vand.u32 4294901760, %v3657_v51  ;;  %v4436_v51 = vld [vmem:[#allocation38_spill] sm:$0xff]  ;;  %v4445_v59 = vand.u32 4294901760, %v3744_v0 }
 0x117   :  { %v624_v57 = vpop.f32.mrf.mxu0  ;;  %v685_v26 = vpop.f32.mrf.mxu1  ;;  %2008 = vmatpush.msra.mxu3 %v2007_v36  ;;  %2148 = vmatpush.msrb.mxu1 %v3634_v53  ;;  %v450_v36 = vadd.f32 %v3558_v3, %v362_v13  ;;  %v4431_v3 = vand.u32 4294901760, %v3628_v25  ;;  %v4441_v13 = vld [vmem:[#allocation53_spill] sm:$0xff] }
 0x118   :  { %v686_v24 = vadd.f32 %v685_v26, %v621_v37  ;;  %v3807_v1 = vpop.f32.mrf.mxu2  ;;  %v3809_v23 = vpop.f32.mrf.mxu3  ;;  %2227 = vmatpush.msrb.mxu2 %v4420_v16  ;;  %2071 = vmatpush.msrb.mxu0 %v3670_v8  ;;  %v625_v47 = vadd.f32 %v624_v57, %v524_v6  ;;  %v366_v42 = vadd.f32 %v3593_v56, %v237_v39  ;;  %v4439_v6 = vand.u32 4294901760, %v3710_v61  ;;  %v4446_v39 = vld [vmem:[#allocation54_spill] sm:$0xff] }
 0x119   :  { %2310 = vmatpush.msrb.mxu3 %v3464_v58  ;;  %v4425_v58 = vld [vmem:[#allocation36_spill] sm:$0xff]  ;;  %2150 = vmatpush.msrb.mxu1 %v3659_v28  ;;  %v530_v57 = vadd.f32 %v3560_v50, %v450_v36 }
 0x11a   :  { %2390 = vst [vmem:[#allocation8 + $0x80] sm:$0xff] %v686_v24  ;;  %2231 = vmatpush.msrb.mxu2 %v4423_v49  ;;  %2074 = vmatpush.msrb.mxu0 %v3698_v10  ;;  %v455_v50 = vadd.f32 %v3601_v31, %v366_v42  ;;  %v4437_v31 = vand.u32 4294901760, %v3698_v10 }
 0x11b   :  { %1335 = vmatmul.f32.gmra.mxu0 %v4421_v30  ;;  %1468 = vmatmul.f32.gmra.mxu1 %v4422_v19 }
 0x11c   :  { %2312 = vmatpush.msrb.mxu3 %v3486_v9  ;;  %2235 = vmatpush.msrb.mxu2 %v4426_v54  ;;  %v536_v49 = vadd.f32 %v3603_v35, %v455_v50  ;;  %v4440_v35 = vld [vmem:[#allocation19_spill] sm:$0xff] }
 0x11d   :  { %1638 = vmatmul.f32.gmra.mxu3 %v3001_v11  ;;  %1559 = vmatmul.f32.gmra.mxu2 %v4425_v58 }
 0x11e   :  { %2314 = vmatpush.msrb.mxu3 %v3500_v18  ;;  %2239 = vmatpush.msrb.mxu2 %v4428_v2 }
 0x11f   :  { %v628_v9 = vpop.f32.mrf.mxu0  ;;  %v689_v12 = vpop.f32.mrf.mxu1  ;;  %2152 = vmatpush.msrb.mxu1 %v3676_v48  ;;  %2077 = vmatpush.msrb.mxu0 %v3710_v61  ;;  %v4443_v61 = vld [vmem:[#allocation41_spill] sm:$0xff] }
 0x120   :  { %2316 = vmatpush.msrb.mxu3 %v3528_v15  ;;  %v690_v37 = vadd.f32 %v689_v12, %v625_v47  ;;  %v3834_v26 = vpop.f32.mrf.mxu2  ;;  %v3836_v18 = vpop.f32.mrf.mxu3  ;;  %v4429_v15 = vld [vmem:[#allocation18_spill] sm:$0xff]  ;;  %2243 = vmatpush.msrb.mxu2 %v4431_v3  ;;  %v629_v29 = vadd.f32 %v628_v9, %v530_v57 }
 0x121   :  { %2154 = vmatpush.msrb.mxu1 %v3700_v32  ;;  %2080 = vmatpush.msrb.mxu0 %v3734_v38 }
 0x122   :  { %2318 = vmatpush.msrb.mxu3 %v3546_v63  ;;  %2394 = vst [vmem:[#allocation8 + $0xa0] sm:$0xff] %v690_v37  ;;  %v4432_v63 = vld [vmem:[#allocation39_spill] sm:$0xff]  ;;  %2247 = vmatpush.msrb.mxu2 %v4433_v52 }
 0x123   :  { %1343 = vmatmul.f32.gmra.mxu0 %v4429_v15  ;;  %1472 = vmatmul.f32.gmra.mxu1 %v4430_v41 }
 0x124   :  { %2320 = vmatpush.msrb.mxu3 %v3574_v22  ;;  %2156 = vmatpush.msrb.mxu1 %v3716_v34 }
 0x125   :  { %1644 = vmatmul.f32.gmra.mxu3 %v3051_v46  ;;  %1564 = vmatmul.f32.gmra.mxu2 %v4432_v63 }
 0x126   :  { %2322 = vmatpush.msrb.mxu3 %v3590_v62  ;;  %v4434_v62 = vand.u32 4294901760, %v3670_v8  ;;  %2083 = vmatpush.msrb.mxu0 %v3744_v0  ;;  %v4438_v8 = vld [vmem:[#allocation51_spill] sm:$0xff]  ;;  %v4448_v0 = vld [vmem:[#allocation44_spill] sm:$0xff] }
 0x127   :  { %v632_v22 = vpop.f32.mrf.mxu0  ;;  %v693_v25 = vpop.f32.mrf.mxu1  ;;  %2158 = vmatpush.msrb.mxu1 %v3736_v60  ;;  %v3876_v20 = vperm.slane %v4438_v8, 1 }
 0x128   :  { %2324 = vmatpush.msrb.mxu3 %v3617_v5  ;;  %v694_v56 = vadd.f32 %v693_v25, %v629_v29  ;;  %v3860_v24 = vpop.f32.mrf.mxu2  ;;  %v3862_v16 = vpop.f32.mrf.mxu3  ;;  %2251 = vmatpush.msrb.mxu2 %v4434_v62  ;;  %v4435_v5 = vld [vmem:[#allocation13_spill] sm:$0xff]  ;;  %v4449_v29 = vand.u32 4294901760, %v3768_v14 }
 0x129   :  { %2086 = vmatpush.msrb.mxu0 %v3761_v55  ;;  %2160 = vmatpush.msrb.mxu1 %v4440_v35  ;;  %v739_v47 = vadd.f32 %v4441_v13, %v3876_v20  ;;  %v747_v3 = vadd.f32 %v4448_v0, %v3876_v20  ;;  %v4451_v55 = vld [vmem:[#allocation15_spill] sm:$0xff] }
 0x12a   :  { %2326 = vmatpush.msrb.mxu3 %v3634_v53  ;;  %2398 = vst [vmem:[#allocation8 + $0xc0] sm:$0xff] %v694_v56  ;;  %2255 = vmatpush.msrb.mxu2 %v4437_v31  ;;  %v633_v53 = vadd.f32 %v632_v22, %v536_v49  ;;  %v4450_v22 = vld [vmem:[#allocation17_spill] sm:$0xff]  ;;  %v4453_v31 = vld [vmem:[#allocation20_spill] sm:$0xff] }
 0x12b   :  { %1351 = vmatmul.f32.gmra.mxu0 %v4435_v5  ;;  %1476 = vmatmul.f32.gmra.mxu1 %v4436_v51  ;;  %v896_v36 = vadd.f32 %v4446_v39, %v739_v47 }
 0x12c   :  { %2328 = vmatpush.msrb.mxu3 %v3659_v28  ;;  %2259 = vmatpush.msrb.mxu2 %v4439_v6 }
 0x12d   :  { %1650 = vmatmul.f32.gmra.mxu3 %v3085_v21  ;;  %1569 = vmatmul.f32.gmra.mxu2 %v3074_v40 }
 0x12e   :  { %2330 = vmatpush.msrb.mxu3 %v3676_v48  ;;  %2089 = vmatpush.msrb.mxu0 %v3768_v14  ;;  %v4442_v48 = vand.u32 4294901760, %v3734_v38  ;;  %v4447_v38 = vld [vmem:[#allocation22_spill] sm:$0xff]  ;;  %v755_v14 = vadd.f32 %v4453_v31, %v3876_v20 }
 0x12f   :  { %v697_v28 = vpop.f32.mrf.mxu1  ;;  %v977_v10 = vpop.f32.mrf.mxu0  ;;  %2162 = vmatpush.msrb.mxu1 %v3757_v45 }
 0x130   :  { %2332 = vmatpush.msrb.mxu3 %v3700_v32  ;;  %v698_v54 = vadd.f32 %v697_v28, %v633_v53  ;;  %v3889_v9 = vpop.f32.mrf.mxu2  ;;  %v3891_v12 = vpop.f32.mrf.mxu3  ;;  %2263 = vmatpush.msrb.mxu2 %v4442_v48  ;;  %v4444_v32 = vld [vmem:[#allocation12_spill] sm:$0xff] }
 0x132   :  { %2334 = vmatpush.msrb.mxu3 %v3716_v34  ;;  %2402 = vst [vmem:[#allocation8 + $0xe0] sm:$0xff] %v698_v54  ;;  %2267 = vmatpush.msrb.mxu2 %v4445_v59  ;;  %v978_v34 = vadd.f32 %v977_v10, %v896_v36  ;;  %v4454_v10 = vld [vmem:[#allocation24_spill] sm:$0xff]  ;;  %v4456_v54 = vld [vmem:[#allocation31_spill] sm:$0xff]  ;;  %v763_v36 = vadd.f32 %v3774_v44, %v3876_v20 }
 0x133   :  { %1480 = vmatmul.f32.gmra.mxu1 %v4443_v61  ;;  %1719 = vmatmul.f32.vlgmr.msra.gmra.mxu0 %v4444_v32  ;;  %v771_v44 = vadd.f32 %v3807_v1, %v3876_v20  ;;  %v779_v1 = vadd.f32 %v3834_v26, %v3876_v20  ;;  %v787_v26 = vadd.f32 %v3860_v24, %v3876_v20 }
 0x134   :  { %2336 = vmatpush.msrb.mxu3 %v3736_v60  ;;  %2271 = vmatpush.msrb.mxu2 %v1999_v33  ;;  %v900_v33 = vadd.f32 %v4451_v55, %v747_v3  ;;  %v908_v0 = vadd.f32 %v3776_v17, %v763_v36  ;;  %v795_v24 = vadd.f32 %v3889_v9, %v3876_v20 }
 0x135   :  { %2010 = vmatmul.f32.vlgmr.msra.gmra.mxu3 %v4444_v32  ;;  %1853 = vmatmul.f32.vlgmr.msra.gmra.mxu2 %v4447_v38  ;;  %v912_v17 = vadd.f32 %v3809_v23, %v771_v44  ;;  %v916_v23 = vadd.f32 %v3836_v18, %v779_v1  ;;  %v920_v18 = vadd.f32 %v3862_v16, %v787_v26 }
 0x136   :  { %2338 = vmatpush.msrb.mxu3 %v4440_v35  ;;  %2275 = vmatpush.msrb.mxu2 %v4449_v29  ;;  %v4455_v35 = vld [vmem:[#allocation45_spill] sm:$0xff]  ;;  %v924_v16 = vadd.f32 %v3891_v12, %v795_v24 }
 0x137   :  { %v982_v37 = vpop.f32.mrf.mxu0  ;;  %v1051_v2 = vpop.f32.mrf.mxu1  ;;  %v904_v13 = vadd.f32 %v4455_v35, %v755_v14 }
 0x138   :  { %2340 = vmatpush.msrb.mxu3 %v3757_v45  ;;  %v1052_v60 = vadd.f32 %v1051_v2, %v978_v34  ;;  %v1162_v57 = vpop.f32.mrf.mxu2  ;;  %v1227_v42 = vpop.f32.mrf.mxu3  ;;  %v4452_v45 = vld [vmem:[#allocation27_spill] sm:$0xff]  ;;  %v983_v50 = vadd.f32 %v982_v37, %v900_v33 }
 0x13a   :  { %v1163_v52 = vadd.f32 %v1162_v57, %v1052_v60  ;;  %v4457_v60 = vld [vmem:[#allocation34_spill] sm:$0xff] }
 0x13b   :  { %1723 = vmatmul.f32.gmra.mxu0 %v4450_v22  ;;  %1784 = vmatmul.f32.vlgmr.msra.gmra.mxu1 %v4444_v32 }
 0x13c   :  { %v1228_v25 = vadd.f32 %v1227_v42, %v1163_v52 }
 0x13d   :  { %2014 = vmatmul.f32.gmra.mxu3 %v4450_v22  ;;  %1861 = vmatmul.f32.gmra.mxu2 %v4452_v45 }
 0x13e   :  { %2375 = vst [vmem:[#allocation8 + $0x8] sm:$0xff] %v1228_v25 }
 0x13f   :  { %v987_v56 = vpop.f32.mrf.mxu0  ;;  %v1057_v62 = vpop.f32.mrf.mxu1 }
 0x140   :  { %v1058_v49 = vadd.f32 %v1057_v62, %v983_v50  ;;  %v1166_v53 = vpop.f32.mrf.mxu2  ;;  %v1231_v6 = vpop.f32.mrf.mxu3  ;;  %v988_v48 = vadd.f32 %v987_v56, %v904_v13 }
 0x142   :  { %v1167_v28 = vadd.f32 %v1166_v53, %v1058_v49 }
 0x143   :  { %1727 = vmatmul.f32.gmra.mxu0 %v4454_v10  ;;  %1788 = vmatmul.f32.gmra.mxu1 %v4450_v22 }
 0x144   :  { %v1232_v47 = vadd.f32 %v1231_v6, %v1167_v28 }
 0x145   :  { %2018 = vmatmul.f32.gmra.mxu3 %v4454_v10  ;;  %1869 = vmatmul.f32.gmra.mxu2 %v4456_v54 }
 0x146   :  { %2379 = vst [vmem:[#allocation8 + $0x28] sm:$0xff] %v1232_v47 }
 0x147   :  { %v992_v59 = vpop.f32.mrf.mxu0  ;;  %v1063_v39 = vpop.f32.mrf.mxu1 }
 0x148   :  { %v1064_v38 = vadd.f32 %v1063_v39, %v988_v48  ;;  %v1170_v34 = vpop.f32.mrf.mxu2  ;;  %v1235_v37 = vpop.f32.mrf.mxu3  ;;  %v993_v57 = vadd.f32 %v992_v59, %v908_v0 }
 0x14a   :  { %v1171_v2 = vadd.f32 %v1170_v34, %v1064_v38 }
 0x14b   :  { %1731 = vmatmul.f32.gmra.mxu0 %v4416_v7  ;;  %1792 = vmatmul.f32.gmra.mxu1 %v4454_v10 }
 0x14c   :  { %v1236_v3 = vadd.f32 %v1235_v37, %v1171_v2 }
 0x14d   :  { %2022 = vmatmul.f32.gmra.mxu3 %v4416_v7  ;;  %1877 = vmatmul.f32.gmra.mxu2 %v4457_v60 }
 0x14e   :  { %2383 = vst [vmem:[#allocation8 + $0x48] sm:$0xff] %v1236_v3 }
 0x14f   :  { %v997_v42 = vpop.f32.mrf.mxu0 }
 0x150   :  { %v1069_v29 = vpop.f32.mrf.mxu1  ;;  %v1174_v55 = vpop.f32.mrf.mxu2  ;;  %v998_v50 = vadd.f32 %v997_v42, %v912_v17 }
 0x151   :  { %v1070_v52 = vadd.f32 %v1069_v29, %v993_v57  ;;  %v1239_v33 = vpop.f32.mrf.mxu3  ;;  %v4458_v29 = vld [vmem:[#allocation14_spill] sm:$0xff] }
 0x153   :  { %v1175_v25 = vadd.f32 %v1174_v55, %v1070_v52  ;;  %1735 = vmatmul.f32.gmra.mxu0 %v4422_v19  ;;  %1796 = vmatmul.f32.gmra.mxu1 %v4416_v7 }
 0x155   :  { %v1240_v45 = vadd.f32 %v1239_v33, %v1175_v25  ;;  %2026 = vmatmul.f32.gmra.mxu3 %v4422_v19  ;;  %1885 = vmatmul.f32.gmra.mxu2 %v4415_v27  ;;  %v4459_v33 = vld [vmem:[#allocation21_spill] sm:$0xff]  ;;  %v4460_v25 = vld [vmem:[#allocation16_spill] sm:$0xff] }
 0x157   :  { %2387 = vst [vmem:[#allocation8 + $0x68] sm:$0xff] %v1240_v45  ;;  %v1002_v56 = vpop.f32.mrf.mxu0 }
 0x158   :  { %v1075_v62 = vpop.f32.mrf.mxu1  ;;  %v1178_v14 = vpop.f32.mrf.mxu2  ;;  %v1003_v27 = vadd.f32 %v1002_v56, %v916_v23 }
 0x159   :  { %v1076_v31 = vadd.f32 %v1075_v62, %v998_v50  ;;  %v1243_v49 = vpop.f32.mrf.mxu3  ;;  %v4462_v62 = vld [vmem:[#allocation23_spill] sm:$0xff] }
 0x15b   :  { %v1179_v53 = vadd.f32 %v1178_v14, %v1076_v31  ;;  %1739 = vmatmul.f32.gmra.mxu0 %v4430_v41  ;;  %1800 = vmatmul.f32.gmra.mxu1 %v4422_v19 }
 0x15d   :  { %v1244_v6 = vadd.f32 %v1243_v49, %v1179_v53  ;;  %2030 = vmatmul.f32.gmra.mxu3 %v4430_v41  ;;  %1893 = vmatmul.f32.gmra.mxu2 %v4421_v30  ;;  %v4463_v49 = vld [vmem:[#allocation29_spill] sm:$0xff]  ;;  %v4464_v53 = vld [vmem:[#allocation28_spill] sm:$0xff] }
 0x15f   :  { %2391 = vst [vmem:[#allocation8 + $0x88] sm:$0xff] %v1244_v6  ;;  %v1007_v28 = vpop.f32.mrf.mxu0 }
 0x160   :  { %v1081_v35 = vpop.f32.mrf.mxu1  ;;  %v1182_v47 = vpop.f32.mrf.mxu2  ;;  %v1008_v30 = vadd.f32 %v1007_v28, %v920_v18  ;;  %v4465_v28 = vld [vmem:[#allocation30_spill] sm:$0xff] }
 0x161   :  { %v1082_v13 = vadd.f32 %v1081_v35, %v1003_v27  ;;  %v1247_v54 = vpop.f32.mrf.mxu3 }
 0x163   :  { %v1183_v48 = vadd.f32 %v1182_v47, %v1082_v13  ;;  %1743 = vmatmul.f32.gmra.mxu0 %v4436_v51  ;;  %1804 = vmatmul.f32.gmra.mxu1 %v4430_v41 }
 0x165   :  { %v1248_v59 = vadd.f32 %v1247_v54, %v1183_v48  ;;  %2034 = vmatmul.f32.gmra.mxu3 %v4436_v51  ;;  %1901 = vmatmul.f32.gmra.mxu2 %v4429_v15 }
 0x167   :  { %2395 = vst [vmem:[#allocation8 + $0xa8] sm:$0xff] %v1248_v59 }
 0x168   :  { %v1012_v39 = vpop.f32.mrf.mxu0  ;;  %v1087_v36 = vpop.f32.mrf.mxu1 }
 0x169   :  { %v1088_v38 = vadd.f32 %v1087_v36, %v1008_v30  ;;  %v1186_v34 = vpop.f32.mrf.mxu2  ;;  %v1251_v37 = vpop.f32.mrf.mxu3  ;;  %v1013_v15 = vadd.f32 %v1012_v39, %v924_v16 }
 0x16b   :  { %v1187_v2 = vadd.f32 %v1186_v34, %v1088_v38  ;;  %1747 = vmatmul.f32.gmra.mxu0 %v4443_v61  ;;  %1808 = vmatmul.f32.gmra.mxu1 %v4436_v51 }
 0x16d   :  { %v1252_v0 = vadd.f32 %v1251_v37, %v1187_v2  ;;  %2038 = vmatmul.f32.gmra.mxu3 %v4443_v61  ;;  %1909 = vmatmul.f32.gmra.mxu2 %v4435_v5 }
 0x16f   :  { %2399 = vst [vmem:[#allocation8 + $0xc8] sm:$0xff] %v1252_v0 }
 0x170   :  { %v1093_v3 = vpop.f32.mrf.mxu1  ;;  %v1296_v60 = vpop.f32.mrf.mxu0 }
 0x171   :  { %v1094_v20 = vadd.f32 %v1093_v3, %v1013_v15  ;;  %v1190_v9 = vpop.f32.mrf.mxu2  ;;  %v1255_v57 = vpop.f32.mrf.mxu3 }
 0x173   :  { %v1191_v42 = vadd.f32 %v1190_v9, %v1094_v20  ;;  %1812 = vmatmul.f32.gmra.mxu1 %v4443_v61  ;;  %2092 = vmatmul.f32.vlgmr.msrb.gmra.mxu0 %v4458_v29 }
 0x175   :  { %v1256_v44 = vadd.f32 %v1255_v57, %v1191_v42  ;;  %2342 = vmatmul.f32.vlgmr.msrb.gmra.mxu3 %v4444_v32  ;;  %2277 = vmatmul.f32.vlgmr.msrb.gmra.mxu2 %v4444_v32  ;;  %v4461_v32 = vld [vmem:[#allocation25_spill] sm:$0xff] }
 0x177   :  { %2403 = vst [vmem:[#allocation8 + $0xe8] sm:$0xff] %v1256_v44 }
 0x178   :  { %v1304_v12 = vpop.f32.mrf.mxu0  ;;  %v1453_v5 = vpop.f32.mrf.mxu1 }
 0x179   :  { %v1535_v52 = vpop.f32.mrf.mxu2  ;;  %v3964_v55 = vpop.f32.mrf.mxu3 }
 0x17b   :  { %2097 = vmatmul.f32.gmra.mxu0 %v4459_v33  ;;  %2166 = vmatmul.f32.vlgmr.msrb.gmra.mxu1 %v4460_v25 }
 0x17d   :  { %2346 = vmatmul.f32.gmra.mxu3 %v4450_v22  ;;  %2281 = vmatmul.f32.gmra.mxu2 %v4450_v22 }
 0x180   :  { %v3970_v17 = vpop.f32.mrf.mxu0  ;;  %v1457_v45 = vpop.f32.mrf.mxu1 }
 0x181   :  { %v1540_v50 = vpop.f32.mrf.mxu2  ;;  %v3972_v56 = vpop.f32.mrf.mxu3 }
 0x183   :  { %2102 = vmatmul.f32.gmra.mxu0 %v4461_v32  ;;  %2172 = vmatmul.f32.gmra.mxu1 %v4462_v62 }
 0x185   :  { %2350 = vmatmul.f32.gmra.mxu3 %v4454_v10  ;;  %2285 = vmatmul.f32.gmra.mxu2 %v4454_v10 }
 0x188   :  { %v3978_v1 = vpop.f32.mrf.mxu0  ;;  %v1461_v31 = vpop.f32.mrf.mxu1 }
 0x189   :  { %v3980_v14 = vpop.f32.mrf.mxu2  ;;  %v3982_v22 = vpop.f32.mrf.mxu3 }
 0x18b   :  { %2107 = vmatmul.f32.gmra.mxu0 %v4463_v49  ;;  %2178 = vmatmul.f32.gmra.mxu1 %v4464_v53 }
 0x18d   :  { %2354 = vmatmul.f32.gmra.mxu3 %v4416_v7  ;;  %2289 = vmatmul.f32.gmra.mxu2 %v4416_v7 }
 0x190   :  { %v3988_v23 = vpop.f32.mrf.mxu0  ;;  %v3990_v6 = vpop.f32.mrf.mxu1 }
 0x191   :  { %v3992_v10 = vpop.f32.mrf.mxu2  ;;  %v3994_v27 = vpop.f32.mrf.mxu3 }
 0x193   :  { %2112 = vmatmul.f32.gmra.mxu0 %v4418_v43  ;;  %2184 = vmatmul.f32.gmra.mxu1 %v4465_v28 }
 0x195   :  { %2358 = vmatmul.f32.gmra.mxu3 %v4422_v19  ;;  %2293 = vmatmul.f32.gmra.mxu2 %v4422_v19 }
 0x198   :  { %v4000_v35 = vpop.f32.mrf.mxu0  ;;  %v4002_v26 = vpop.f32.mrf.mxu1 }
 0x199   :  { %v4004_v7 = vpop.f32.mrf.mxu2  ;;  %v4006_v13 = vpop.f32.mrf.mxu3 }
 0x19b   :  { %2117 = vmatmul.f32.gmra.mxu0 %v4425_v58  ;;  %2190 = vmatmul.f32.gmra.mxu1 %v2951_v4  ;;  %v4023_v58 = vperm.slane %v4438_v8, 2 }
 0x19d   :  { %2362 = vmatmul.f32.gmra.mxu3 %v4430_v41  ;;  %2297 = vmatmul.f32.gmra.mxu2 %v4430_v41  ;;  %v1297_v48 = vadd.f32 %v1296_v60, %v4023_v58  ;;  %v1305_v8 = vadd.f32 %v1304_v12, %v4023_v58  ;;  %v1321_v9 = vadd.f32 %v3978_v1, %v4023_v58 }
 0x19e   :  { %v1329_v25 = vadd.f32 %v3988_v23, %v4023_v58 }
 0x1a0   :  { %v4012_v43 = vpop.f32.mrf.mxu0  ;;  %v4014_v47 = vpop.f32.mrf.mxu1  ;;  %v1470_v62 = vadd.f32 %v4002_v26, %v1329_v25 }
 0x1a1   :  { %v4016_v19 = vpop.f32.mrf.mxu2  ;;  %v4018_v54 = vpop.f32.mrf.mxu3 }
 0x1a2   :  { %v1556_v49 = vadd.f32 %v4004_v7, %v1470_v62 }
 0x1a3   :  { %2122 = vmatmul.f32.gmra.mxu0 %v4432_v63  ;;  %2196 = vmatmul.f32.gmra.mxu1 %v3001_v11  ;;  %v1454_v11 = vadd.f32 %v1453_v5, %v1297_v48  ;;  %v1466_v5 = vadd.f32 %v3990_v6, %v1321_v9 }
 0x1a5   :  { %2366 = vmatmul.f32.gmra.mxu3 %v4436_v51  ;;  %2301 = vmatmul.f32.gmra.mxu2 %v4436_v51  ;;  %v1536_v30 = vadd.f32 %v1535_v52, %v1454_v11  ;;  %v1345_v11 = vadd.f32 %v4012_v43, %v4023_v58 }
 0x1a8   :  { %v4027_v4 = vpop.f32.mrf.mxu0  ;;  %v4029_v41 = vpop.f32.mrf.mxu1 }
 0x1a9   :  { %v4032_v18 = vpop.f32.mrf.mxu2  ;;  %v4034_v59 = vpop.f32.mrf.mxu3 }
 0x1ab   :  { %2127 = vmatmul.f32.gmra.mxu0 %v3074_v40  ;;  %2202 = vmatmul.f32.gmra.mxu1 %v3051_v46  ;;  %v1610_v40 = vadd.f32 %v3964_v55, %v1536_v30  ;;  %v1458_v46 = vadd.f32 %v1457_v45, %v1305_v8 }
 0x1ad   :  { %2370 = vmatmul.f32.gmra.mxu3 %v4443_v61  ;;  %2305 = vmatmul.f32.gmra.mxu2 %v4443_v61  ;;  %v1313_v61 = vadd.f32 %v3970_v17, %v4023_v58  ;;  %v1541_v37 = vadd.f32 %v1540_v50, %v1458_v46  ;;  %v1551_v17 = vadd.f32 %v3992_v10, %v1466_v5 }
 0x1ae   :  { %v1634_v10 = vadd.f32 %v4006_v13, %v1556_v49  ;;  %v1478_v13 = vadd.f32 %v4029_v41, %v1345_v11 }
 0x1af   :  { %v1616_v15 = vadd.f32 %v3972_v56, %v1541_v37  ;;  %v1462_v3 = vadd.f32 %v1461_v31, %v1313_v61  ;;  %v1628_v32 = vadd.f32 %v3994_v27, %v1551_v17 }
 0x1b0   :  { %v4040_v63 = vpop.f32.mrf.mxu1  ;;  %v1720_v51 = vpop.f32.mrf.mxu0  ;;  %v1566_v43 = vadd.f32 %v4032_v18, %v1478_v13  ;;  %v2434_v18 = vld [vmem:[#allocation7] sm:$0xf] }
 0x1b1   :  { %v4043_v39 = vpop.f32.mrf.mxu2  ;;  %v4045_v36 = vpop.f32.mrf.mxu3  ;;  %v1721_v24 = vadd.f32 %v1720_v51, %v1610_v40  ;;  %v1546_v57 = vadd.f32 %v3980_v14, %v1462_v3 }
 0x1b2   :  { %v1646_v61 = vadd.f32 %v4034_v59, %v1566_v43 }
 0x1b3   :  { %2208 = vmatmul.f32.gmra.mxu1 %v3085_v21  ;;  %v1622_v12 = vadd.f32 %v3982_v22, %v1546_v57  ;;  %v1337_v22 = vadd.f32 %v4000_v35, %v4023_v58 }
 0x1b5   :  { %v1474_v27 = vadd.f32 %v4014_v47, %v1337_v22 }
 0x1b7   :  { %v1561_v35 = vadd.f32 %v4016_v19, %v1474_v27 }
 0x1b8   :  { %v1724_v38 = vpop.f32.mrf.mxu0  ;;  %v1785_v34 = vpop.f32.mrf.mxu1 }
 0x1b9   :  { %v1786_v2 = vadd.f32 %v1785_v34, %v1721_v24  ;;  %v4051_v16 = vpop.f32.mrf.mxu2  ;;  %v4053_v0 = vpop.f32.mrf.mxu3  ;;  %v1725_v21 = vadd.f32 %v1724_v38, %v1616_v15  ;;  %v1640_v30 = vadd.f32 %v4018_v54, %v1561_v35  ;;  %v1353_v24 = vadd.f32 %v4027_v4, %v4023_v58 }
 0x1bb   :  { %2376 = vst [vmem:[#allocation8 + $0x10] sm:$0xff] %v1786_v2  ;;  %v1482_v54 = vadd.f32 %v4040_v63, %v1353_v24 }
 0x1bd   :  { %v1571_v15 = vadd.f32 %v4043_v39, %v1482_v54 }
 0x1bf   :  { %v1652_v4 = vadd.f32 %v4045_v36, %v1571_v15 }
 0x1c0   :  { %v1728_v60 = vpop.f32.mrf.mxu0  ;;  %v1789_v20 = vpop.f32.mrf.mxu1 }
 0x1c1   :  { %v1790_v42 = vadd.f32 %v1789_v20, %v1725_v21  ;;  %v4059_v29 = vpop.f32.mrf.mxu2  ;;  %v4061_v44 = vpop.f32.mrf.mxu3  ;;  %v1729_v52 = vadd.f32 %v1728_v60, %v1622_v12  ;;  %v4107_v60 = vperm.slane %v2434_v18, 3 }
 0x1c3   :  { %2380 = vst [vmem:[#allocation8 + $0x30] sm:$0xff] %v1790_v42  ;;  %v1855_v63 = vadd.f32 %v4051_v16, %v4107_v60 }
 0x1c5   :  { %v2012_v12 = vadd.f32 %v4053_v0, %v1855_v63 }
 0x1c8   :  { %v1732_v55 = vpop.f32.mrf.mxu0  ;;  %v1793_v33 = vpop.f32.mrf.mxu1 }
 0x1c9   :  { %v1794_v45 = vadd.f32 %v1793_v33, %v1729_v52  ;;  %v4068_v50 = vpop.f32.mrf.mxu2  ;;  %v4070_v56 = vpop.f32.mrf.mxu3  ;;  %v1733_v1 = vadd.f32 %v1732_v55, %v1628_v32  ;;  %v1863_v55 = vadd.f32 %v4059_v29, %v4107_v60 }
 0x1ca   :  { %v1871_v0 = vadd.f32 %v4068_v50, %v4107_v60 }
 0x1cb   :  { %2384 = vst [vmem:[#allocation8 + $0x50] sm:$0xff] %v1794_v45  ;;  %v2016_v16 = vadd.f32 %v4061_v44, %v1863_v55 }
 0x1cc   :  { %v2020_v29 = vadd.f32 %v4070_v56, %v1871_v0 }
 0x1d0   :  { %v1736_v31 = vpop.f32.mrf.mxu0  ;;  %v1797_v14 = vpop.f32.mrf.mxu1 }
 0x1d1   :  { %v1798_v53 = vadd.f32 %v1797_v14, %v1733_v1  ;;  %v4077_v23 = vpop.f32.mrf.mxu2  ;;  %v4079_v6 = vpop.f32.mrf.mxu3  ;;  %v1737_v28 = vadd.f32 %v1736_v31, %v1634_v10 }
 0x1d2   :  { %v1879_v44 = vadd.f32 %v4077_v23, %v4107_v60 }
 0x1d3   :  { %2388 = vst [vmem:[#allocation8 + $0x70] sm:$0xff] %v1798_v53 }
 0x1d4   :  { %v2024_v50 = vadd.f32 %v4079_v6, %v1879_v44 }
 0x1d8   :  { %v1740_v26 = vpop.f32.mrf.mxu0  ;;  %v1801_v48 = vpop.f32.mrf.mxu1 }
 0x1d9   :  { %v1802_v51 = vadd.f32 %v1801_v48, %v1737_v28  ;;  %v4086_v7 = vpop.f32.mrf.mxu2  ;;  %v4088_v8 = vpop.f32.mrf.mxu3  ;;  %v1741_v40 = vadd.f32 %v1740_v26, %v1640_v30 }
 0x1da   :  { %v1887_v56 = vadd.f32 %v4086_v7, %v4107_v60 }
 0x1db   :  { %2392 = vst [vmem:[#allocation8 + $0x90] sm:$0xff] %v1802_v51 }
 0x1dc   :  { %v2028_v23 = vadd.f32 %v4088_v8, %v1887_v56 }
 0x1e0   :  { %v1744_v47 = vpop.f32.mrf.mxu0  ;;  %v1805_v46 = vpop.f32.mrf.mxu1 }
 0x1e1   :  { %v1806_v38 = vadd.f32 %v1805_v46, %v1741_v40  ;;  %v4095_v19 = vpop.f32.mrf.mxu2  ;;  %v4097_v34 = vpop.f32.mrf.mxu3  ;;  %v1745_v37 = vadd.f32 %v1744_v47, %v1646_v61 }
 0x1e2   :  { %v1895_v6 = vadd.f32 %v4095_v19, %v4107_v60 }
 0x1e3   :  { %2396 = vst [vmem:[#allocation8 + $0xb0] sm:$0xff] %v1806_v38 }
 0x1e4   :  { %v2032_v7 = vadd.f32 %v4097_v34, %v1895_v6 }
 0x1e8   :  { %v1748_v41 = vpop.f32.mrf.mxu0  ;;  %v1809_v2 = vpop.f32.mrf.mxu1 }
 0x1e9   :  { %v1810_v3 = vadd.f32 %v1809_v2, %v1745_v37  ;;  %v4102_v21 = vpop.f32.mrf.mxu2  ;;  %v4104_v58 = vpop.f32.mrf.mxu3  ;;  %v1749_v20 = vadd.f32 %v1748_v41, %v1652_v4 }
 0x1ea   :  { %v1903_v8 = vadd.f32 %v4102_v21, %v4107_v60 }
 0x1eb   :  { %2400 = vst [vmem:[#allocation8 + $0xd0] sm:$0xff] %v1810_v3 }
 0x1ec   :  { %v2036_v19 = vadd.f32 %v4104_v58, %v1903_v8 }
 0x1f0   :  { %v1813_v59 = vpop.f32.mrf.mxu1  ;;  %v2093_v9 = vpop.f32.mrf.mxu0 }
 0x1f1   :  { %v1814_v57 = vadd.f32 %v1813_v59, %v1749_v20  ;;  %v4111_v42 = vpop.f32.mrf.mxu2  ;;  %v4113_v39 = vpop.f32.mrf.mxu3  ;;  %v2094_v5 = vadd.f32 %v2093_v9, %v2012_v12 }
 0x1f2   :  { %v1911_v34 = vadd.f32 %v4111_v42, %v4107_v60 }
 0x1f3   :  { %2404 = vst [vmem:[#allocation8 + $0xf0] sm:$0xff] %v1814_v57 }
 0x1f4   :  { %v2040_v21 = vadd.f32 %v4113_v39, %v1911_v34 }
 0x1f8   :  { %v2098_v52 = vpop.f32.mrf.mxu0  ;;  %v2167_v36 = vpop.f32.mrf.mxu1 }
 0x1f9   :  { %v2168_v33 = vadd.f32 %v2167_v36, %v2094_v5  ;;  %v2278_v25 = vpop.f32.mrf.mxu2  ;;  %v2343_v17 = vpop.f32.mrf.mxu3  ;;  %v2099_v62 = vadd.f32 %v2098_v52, %v2016_v16 }
 0x1fb   :  { %v2279_v45 = vadd.f32 %v2278_v25, %v2168_v33 }
 0x1fd   :  { %v2344_v32 = vadd.f32 %v2343_v17, %v2279_v45 }
 0x1ff   :  { %2377 = vst [vmem:[#allocation8 + $0x18] sm:$0xff] %v2344_v32 }
 0x200   :  { %v2103_v1 = vpop.f32.mrf.mxu0  ;;  %v2173_v31 = vpop.f32.mrf.mxu1 }
 0x201   :  { %v2174_v14 = vadd.f32 %v2173_v31, %v2099_v62  ;;  %v2282_v22 = vpop.f32.mrf.mxu2  ;;  %v2347_v49 = vpop.f32.mrf.mxu3  ;;  %v2104_v27 = vadd.f32 %v2103_v1, %v2020_v29 }
 0x203   :  { %v2283_v53 = vadd.f32 %v2282_v22, %v2174_v14 }
 0x205   :  { %v2348_v10 = vadd.f32 %v2347_v49, %v2283_v53 }
 0x207   :  { %2381 = vst [vmem:[#allocation8 + $0x38] sm:$0xff] %v2348_v10 }
 0x208   :  { %v2108_v28 = vpop.f32.mrf.mxu0  ;;  %v2179_v26 = vpop.f32.mrf.mxu1 }
 0x209   :  { %v2180_v48 = vadd.f32 %v2179_v26, %v2104_v27  ;;  %v2286_v11 = vpop.f32.mrf.mxu2  ;;  %v2351_v35 = vpop.f32.mrf.mxu3  ;;  %v2109_v13 = vadd.f32 %v2108_v28, %v2024_v50 }
 0x20b   :  { %v2287_v51 = vadd.f32 %v2286_v11, %v2180_v48 }
 0x20d   :  { %v2352_v30 = vadd.f32 %v2351_v35, %v2287_v51 }
 0x20f   :  { %2385 = vst [vmem:[#allocation8 + $0x58] sm:$0xff] %v2352_v30 }
 0x210   :  { %v2113_v40 = vpop.f32.mrf.mxu0  ;;  %v2185_v47 = vpop.f32.mrf.mxu1 }
 0x211   :  { %v2186_v46 = vadd.f32 %v2185_v47, %v2109_v13  ;;  %v2290_v24 = vpop.f32.mrf.mxu2  ;;  %v2355_v43 = vpop.f32.mrf.mxu3  ;;  %v2114_v54 = vadd.f32 %v2113_v40, %v2028_v23 }
 0x213   :  { %v2291_v38 = vadd.f32 %v2290_v24, %v2186_v46 }
 0x215   :  { %v2356_v61 = vadd.f32 %v2355_v43, %v2291_v38 }
 0x217   :  { %2389 = vst [vmem:[#allocation8 + $0x78] sm:$0xff] %v2356_v61 }
 0x218   :  { %v2118_v37 = vpop.f32.mrf.mxu0  ;;  %v2191_v41 = vpop.f32.mrf.mxu1 }
 0x219   :  { %v2192_v2 = vadd.f32 %v2191_v41, %v2114_v54  ;;  %v2294_v15 = vpop.f32.mrf.mxu2  ;;  %v2359_v3 = vpop.f32.mrf.mxu3  ;;  %v2119_v20 = vadd.f32 %v2118_v37, %v2032_v7 }
 0x21b   :  { %v2295_v4 = vadd.f32 %v2294_v15, %v2192_v2 }
 0x21d   :  { %v2360_v18 = vadd.f32 %v2359_v3, %v2295_v4 }
 0x21f   :  { %2393 = vst [vmem:[#allocation8 + $0x98] sm:$0xff] %v2360_v18 }
 0x220   :  { %v2197_v59 = vpop.f32.mrf.mxu1  ;;  %v2123_v12 = vpop.f32.mrf.mxu0 }
 0x221   :  { %v2198_v9 = vadd.f32 %v2197_v59, %v2119_v20  ;;  %v2298_v63 = vpop.f32.mrf.mxu2  ;;  %v2363_v57 = vpop.f32.mrf.mxu3  ;;  %v2124_v36 = vadd.f32 %v2123_v12, %v2036_v19 }
 0x223   :  { %v2299_v5 = vadd.f32 %v2298_v63, %v2198_v9 }
 0x225   :  { %v2364_v52 = vadd.f32 %v2363_v57, %v2299_v5 }
 0x227   :  { %2397 = vst [vmem:[#allocation8 + $0xb8] sm:$0xff] %v2364_v52 }
 0x228   :  { %v2203_v55 = vpop.f32.mrf.mxu1  ;;  %v2128_v16 = vpop.f32.mrf.mxu0 }
 0x229   :  { %v2204_v33 = vadd.f32 %v2203_v55, %v2124_v36  ;;  %v2302_v25 = vpop.f32.mrf.mxu2  ;;  %v2367_v17 = vpop.f32.mrf.mxu3  ;;  %v2129_v62 = vadd.f32 %v2128_v16, %v2040_v21 }
 0x22b   :  { %v2303_v45 = vadd.f32 %v2302_v25, %v2204_v33 }
 0x22d   :  { %v2368_v32 = vadd.f32 %v2367_v17, %v2303_v45 }
 0x22f   :  { %2401 = vst [vmem:[#allocation8 + $0xd8] sm:$0xff] %v2368_v32 }
 0x230   :  { %v2209_v1 = vpop.f32.mrf.mxu1 }
 0x231   :  { %v2210_v31 = vadd.f32 %v2209_v1, %v2129_v62  ;;  %v2306_v58 = vpop.f32.mrf.mxu2  ;;  %v2371_v0 = vpop.f32.mrf.mxu3 }
 0x233   :  { %v2307_v60 = vadd.f32 %v2306_v58, %v2210_v31 }
 0x235   :  { %v2372_v42 = vadd.f32 %v2371_v0, %v2307_v60 }
 0x237   :  { %2405 = vst [vmem:[#allocation8 + $0xf8] sm:$0xff] %v2372_v42 }
 0x238   :  { %2418 = dma.vmem_to_hbm [thread:$0]  %s2411_s29, 4096, %s2413_s5, [#allocation4], %s2538_s20, %s2538_s20, %s2539_s21  }
 0x239   :  { %2535 = dma.done.wait [#allocation4], 4096  }
 0x23a   :  { %2536 = vsyncadd [#allocation4], 4294963200 }
 0x23b   :  { %2423 = vsyncpa [#allocation3], 1 }
 0x23c   :  { %2424 = vsyncpa [#allocation6], 1 }
 0x23d   :  { %2425 = vsyncpa [#allocation4], 1 }

</bundles_post_ra>
